<compile_context>
chip_gen: v7x
topology: tpu7x:2x2x1
jax: 0.10.0
libtpu: 0.0.40
codegen_flags: <defaults>
</compile_context>

<pallas_src>
import math

import jax
import jax.numpy as jnp
from jax.experimental import pallas as pl
from jax.experimental.pallas import tpu as pltpu

# ------------------------- small hyper-params (consistent with the module) ----------
B = 2          # batch
T_CTX = 16     # GPT context length (prev_tokens_with_context)
T = 8          # selected decoder positions per row (# of ones in prev_tokens_index)
S = 10         # encoder source length
D = 32         # embed_dim
C = 16         # conv channels (out_channels of every conv layer)
K = 3          # conv kernel size
L = 2          # number of conv/attention layers   -> convolutions = ((C, K),) * L
V = 50         # len(dictionary)
VP = 128       # vocab padded to a full lane tile (lane-dense fc2 + output store)
DROPOUT = 0.1  # only affects init std; forward runs in eval mode (dropout = identity)
LN_EPS = 1e-5
NEG = -1e30    # finite "-inf" sentinel
BT = B * T
BS = B * S
PH = jax.lax.Precision.HIGHEST


# ---------------- slab layouts: lane-dense (rows, 128) f32, 8-row-aligned sections ---
class _Slab:
    def __init__(self):
        self.layout = {}
        self._rows = 0

    def add(self, name, nrows, ncols):
        r0 = ((self._rows + 7) // 8) * 8
        self.layout[name] = (r0, nrows, ncols)
        self._rows = r0 + nrows

    @property
    def rows(self):
        return ((self._rows + 7) // 8) * 8


_w = _Slab()
_w.add('ln_g', 1, D)
_w.add('ln_b', 1, D)
_w.add('fc1_w', D, C)
_w.add('fc1_b', 1, C)
for _l in range(L):
    _w.add(f'conv_w{_l}', K * C, 2 * C)
    _w.add(f'conv_b{_l}', 1, 2 * C)
    _w.add(f'ain_w{_l}', C, D)
    _w.add(f'ain_b{_l}', 1, D)
    _w.add(f'aout_w{_l}', D, C)
    _w.add(f'aout_b{_l}', 1, C)
_w.add('fcg_x', 1, C)
_w.add('fcg_te', 1, D)
_w.add('fcg_b', 1, 1)
_w.add('fc2_w', C, VP)
_w.add('fc2_b', 1, VP)
W_LAYOUT, W_ROWS = _w.layout, _w.rows

_d = _Slab()
_d.add('x', BT, D)          # gathered + flattened GPT embeddings
_d.add('enc_a', D, BS)      # encoder_a transposed, batch-stacked along lanes
_d.add('enc_b', BS, D)      # encoder_b, batch-stacked along rows
_d.add('bias', BT, BS)      # additive score bias: NEG on pad / cross-batch columns
_d.add('onehot', BS, VP)    # one-hot(src_tokens), batch-stacked, padded cols = 0
D_LAYOUT, D_ROWS = _d.layout, _d.rows


def _put(slab, layout, name, arr):
    r0, nr, nc = layout[name]
    return slab.at[r0:r0 + nr, 0:nc].set(jnp.asarray(arr, jnp.float32).reshape(nr, nc))


# ----------------------------------- kernel ----------------------------------------
def decoder_kernel(d_ref, w_ref, out_ref):
    # d_ref:   (D_ROWS, 128) packed per-call tensors
    # w_ref:   (W_ROWS, 128) packed weights
    # out_ref: (BT, 2*VP)    lanes [0:VP)  = log(p_gen*softmax(fc2) + copy)
    #                        lanes [VP:VP+BS) = avg attention scores, rest zero

    def dsl(name):
        r0, nr, nc = D_LAYOUT[name]
        return d_ref[r0:r0 + nr, 0:nc]

    def wsl(name, row0=0, nrows=None):
        r0, nr, nc = W_LAYOUT[name]
        nrows = nr if nrows is None else nrows
        return w_ref[r0 + row0:r0 + row0 + nrows, 0:nc]

    x_emb = dsl('x')                 # (BT, D)
    enc_a = dsl('enc_a')             # (D, BS)
    enc_b = dsl('enc_b')             # (BS, D)
    score_bias = dsl('bias')         # (BT, BS)
    onehot = dsl('onehot')           # (BS, VP)

    # embed_norm = nn.LayerNorm(embed_dim); F.dropout is identity in eval mode
    mu = jnp.mean(x_emb, axis=-1, keepdims=True)
    var = jnp.mean((x_emb - mu) ** 2, axis=-1, keepdims=True)
    te = (x_emb - mu) * jax.lax.rsqrt(var + LN_EPS) * wsl('ln_g') + wsl('ln_b')
    target_embedding = te                                     # (BT, D)

    # fc1: embed_dim -> conv channels
    x = jnp.dot(te, wsl('fc1_w'), preferred_element_type=jnp.float32) + wsl('fc1_b')

    sqrt_half = jnp.float32(math.sqrt(0.5))
    attn_scale = jnp.float32(S * math.sqrt(1.0 / S))          # s * sqrt(1/s)

    # Causal-conv shift guard over the fused (B*T) slab: a roll by s must not read
    # the previous batch's tail, so rows with (row mod T) < s are zeroed.
    row_in_batch = jax.lax.broadcasted_iota(jnp.int32, (BT, 1), 0) % T

    avg_attn = jnp.zeros((BT, BS), jnp.float32)
    copy_scores = None
    for l in range(L):
        # --- causal ConvTBC (padding=K-1, remove_future) + GLU: K accumulating dots
        y = jnp.dot(x, wsl(f'conv_w{l}', (K - 1) * C, C),
                    preferred_element_type=jnp.float32)            # tap shift 0
        for s in range(1, K):
            shifted = jnp.where(row_in_batch >= s,
                                pltpu.roll(x, shift=s, axis=0), 0.0)
            y = y + jnp.dot(shifted, wsl(f'conv_w{l}', (K - 1 - s) * C, C),
                            preferred_element_type=jnp.float32)
        y = y + wsl(f'conv_b{l}')                                  # (BT, 2C)
        x = y[:, :C] * jax.nn.sigmoid(y[:, C:2 * C])               # GLU -> (BT, C)

        # --- AttentionLayer (block-diagonal over the fused batch) ------------------
        residual = x
        z = (jnp.dot(x, wsl(f'ain_w{l}'), preferred_element_type=jnp.float32)
             + wsl(f'ain_b{l}') + target_embedding) * sqrt_half    # (BT, D)
        scores = (jnp.dot(z, enc_a, preferred_element_type=jnp.float32)
                  + score_bias)                                    # (BT, BS)
        m = jnp.max(scores, axis=-1, keepdims=True)
        e = jnp.exp(scores - m)                                    # pad/cross-batch -> 0
        attn = e / jnp.sum(e, axis=-1, keepdims=True)              # exact softmax
        avg_attn = avg_attn + attn * (1.0 / L)
        copy_scores = attn
        ctx = (jnp.dot(attn, enc_b, preferred_element_type=jnp.float32)
               * attn_scale)                                       # (BT, D)
        x = (jnp.dot(ctx, wsl(f'aout_w{l}'), preferred_element_type=jnp.float32)
             + wsl(f'aout_b{l}') + residual) * sqrt_half           # (BT, C)

    # --- pointer-generator head (no materialized cat([x, te])) -----------------------
    p_gen = jax.nn.sigmoid(
        jnp.sum(x * wsl('fcg_x'), axis=-1, keepdims=True)
        + jnp.sum(target_embedding * wsl('fcg_te'), axis=-1, keepdims=True)
        + wsl('fcg_b'))                                            # (BT, 1)

    # fc2 + softmax over padded vocab (padded bias lanes = -1e30 -> prob 0)
    logits = (jnp.dot(x, wsl('fc2_w'), preferred_element_type=jnp.float32)
              + wsl('fc2_b'))                                      # (BT, VP)
    lm = jnp.max(logits, axis=-1, keepdims=True)
    le = jnp.exp(logits - lm)
    probs = le / jnp.sum(le, axis=-1, keepdims=True) * p_gen       # exact softmax

    # scatter_add(2, src_tokens, copy_scores * (1 - p_gen)) == one-hot matmul
    copy_dist = jnp.dot(copy_scores * (1.0 - p_gen), onehot,
                        preferred_element_type=jnp.float32)        # (BT, VP)

    out_log = jnp.log(probs + copy_dist + 1e-32)
    out_ref[...] = jnp.concatenate(
        [out_log, avg_attn, jnp.zeros((BT, VP - BS), jnp.float32)], axis=-1)


# ----------------------------------- wrapper ----------------------------------------
def pack_weights(p):
    """Pack all weights into one lane-dense (W_ROWS, 128) f32 slab (built once)."""
    slab = jnp.zeros((W_ROWS, 128), jnp.float32)
    slab = _put(slab, W_LAYOUT, 'ln_g', p['ln_g'])
    slab = _put(slab, W_LAYOUT, 'ln_b', p['ln_b'])
    slab = _put(slab, W_LAYOUT, 'fc1_w', p['fc1_w'])
    slab = _put(slab, W_LAYOUT, 'fc1_b', p['fc1_b'])
    for l in range(L):
        slab = _put(slab, W_LAYOUT, f'conv_w{l}', p['conv_w'][l])
        slab = _put(slab, W_LAYOUT, f'conv_b{l}', p['conv_b'][l])
        slab = _put(slab, W_LAYOUT, f'ain_w{l}', p['ain_w'][l])
        slab = _put(slab, W_LAYOUT, f'ain_b{l}', p['ain_b'][l])
        slab = _put(slab, W_LAYOUT, f'aout_w{l}', p['aout_w'][l])
        slab = _put(slab, W_LAYOUT, f'aout_b{l}', p['aout_b'][l])
    slab = _put(slab, W_LAYOUT, 'fcg_x', p['fcg_w'][:, :C])
    slab = _put(slab, W_LAYOUT, 'fcg_te', p['fcg_w'][:, C:])
    slab = _put(slab, W_LAYOUT, 'fcg_b', p['fcg_b'])
    fc2_w_pad = jnp.zeros((C, VP), jnp.float32).at[:, :V].set(p['fc2_w'])
    fc2_b_pad = jnp.full((1, VP), NEG, jnp.float32).at[:, :V].set(p['fc2_b'])
    slab = _put(slab, W_LAYOUT, 'fc2_w', fc2_w_pad)
    slab = _put(slab, W_LAYOUT, 'fc2_b', fc2_b_pad)
    return slab


def pack_data(x_emb, enc_a_t, enc_b, pad_mask, src_tokens):
    """Pack all per-call tensors into one lane-dense (D_ROWS, 128) f32 slab."""
    slab = jnp.zeros((D_ROWS, 128), jnp.float32)
    slab = _put(slab, D_LAYOUT, 'x', x_emb.reshape(BT, D))
    slab = _put(slab, D_LAYOUT, 'enc_a',
                jnp.transpose(enc_a_t, (1, 0, 2)).reshape(D, BS))
    slab = _put(slab, D_LAYOUT, 'enc_b', enc_b.reshape(BS, D))
    row_b = jnp.repeat(jnp.arange(B), T)          # (BT,)  batch of each fused row
    col_b = jnp.repeat(jnp.arange(B), S)          # (BS,)  batch of each stacked col
    pad_flat = pad_mask.reshape(BS)
    bias = jnp.where((row_b[:, None] != col_b[None, :]) | pad_flat[None, :],
                     jnp.float32(NEG), jnp.float32(0.0))
    slab = _put(slab, D_LAYOUT, 'bias', bias)
    slab = _put(slab, D_LAYOUT, 'onehot',
                jax.nn.one_hot(src_tokens.reshape(BS), VP, dtype=jnp.float32))
    return slab


@jax.jit
def gpt_fconv_decoder(x_emb, enc_a_t, enc_b, pad_mask, src_tokens, w_slab):
    d_slab = pack_data(x_emb, enc_a_t, enc_b, pad_mask, src_tokens)

    vmem = pl.BlockSpec(memory_space=pltpu.MemorySpace.VMEM)
    out_slab = pl.pallas_call(
        decoder_kernel,
        out_shape=jax.ShapeDtypeStruct((BT, 2 * VP), jnp.float32),
        in_specs=[vmem, vmem],
        out_specs=vmem,
    )(d_slab, w_slab)

    out = out_slab[:, :V].reshape(B, T, V)
    avg = out_slab[:, VP:VP + BS]                                   # (BT, BS)
    attn = jnp.stack([avg[b * T:(b + 1) * T, b * S:(b + 1) * S] for b in range(B)],
                     axis=0)                                        # (B, T, S)
    return out, attn


# -------------------------------- param init (deterministic) ------------------------
def init_params(key):
    ks = jax.random.split(key, 6)
    std_fc1 = math.sqrt((1.0 - DROPOUT) / D)
    std_conv = math.sqrt(4.0 * (1.0 - DROPOUT) / (K * C))
    std_ain = math.sqrt(1.0 / C)
    std_aout = math.sqrt(1.0 / D)
    std_fcg = math.sqrt(1.0 / (D + C))
    std_fc2 = math.sqrt(1.0 / C)
    return dict(
        ln_g=jnp.ones((1, D), jnp.float32),
        ln_b=jnp.zeros((1, D), jnp.float32),
        fc1_w=(jax.random.normal(ks[0], (D, C)) * std_fc1).astype(jnp.float32),
        fc1_b=jnp.zeros((1, C), jnp.float32),
        conv_w=(jax.random.normal(ks[1], (L, K, C, 2 * C)) * std_conv).astype(jnp.float32),
        conv_b=jnp.zeros((L, 1, 2 * C), jnp.float32),
        ain_w=(jax.random.normal(ks[2], (L, C, D)) * std_ain).astype(jnp.float32),
        ain_b=jnp.zeros((L, 1, D), jnp.float32),
        aout_w=(jax.random.normal(ks[3], (L, D, C)) * std_aout).astype(jnp.float32),
        aout_b=jnp.zeros((L, 1, C), jnp.float32),
        fcg_w=(jax.random.normal(ks[4], (1, C + D)) * std_fcg).astype(jnp.float32),
        fcg_b=jnp.zeros((1, 1), jnp.float32),
        fc2_w=(jax.random.normal(ks[5], (C, V)) * std_fc2).astype(jnp.float32),
        fc2_b=jnp.zeros((1, V), jnp.float32),
    )


# -------------------------------- pure-JAX reference --------------------------------
def reference_forward(x_emb, enc_a_t, enc_b, pad_bool, src_tokens, p):
    mu = jnp.mean(x_emb, axis=-1, keepdims=True)
    var = jnp.mean((x_emb - mu) ** 2, axis=-1, keepdims=True)
    te = (x_emb - mu) / jnp.sqrt(var + LN_EPS) * p['ln_g'][0] + p['ln_b'][0]
    x = jnp.einsum('btd,dc->btc', te, p['fc1_w'], precision=PH) + p['fc1_b'][0]
    sqrt_half = math.sqrt(0.5)
    attn_scale = S * math.sqrt(1.0 / S)
    avg_attn = jnp.zeros((B, T, S), jnp.float32)
    copy_scores = None
    for l in range(L):
        x_pad = jnp.pad(x, ((0, 0), (K - 1, 0), (0, 0)))
        y = jnp.zeros((B, T, 2 * C), jnp.float32) + p['conv_b'][l, 0]
        for k in range(K):
            y = y + jnp.einsum('btc,co->bto', x_pad[:, k:k + T, :],
                               p['conv_w'][l, k], precision=PH)
        x = y[..., :C] * jax.nn.sigmoid(y[..., C:])
        residual = x
        z = (jnp.einsum('btc,cd->btd', x, p['ain_w'][l], precision=PH)
             + p['ain_b'][l, 0] + te) * sqrt_half
        scores = jnp.einsum('btd,bds->bts', z, enc_a_t, precision=PH)
        scores = jnp.where(pad_bool[:, None, :], -jnp.inf, scores)
        attn = jax.nn.softmax(scores, axis=-1)
        avg_attn = avg_attn + attn / L
        copy_scores = attn
        ctx = jnp.einsum('bts,bsd->btd', attn, enc_b, precision=PH) * attn_scale
        x = (jnp.einsum('btd,dc->btc', ctx, p['aout_w'][l], precision=PH)
             + p['aout_b'][l, 0] + residual) * sqrt_half
    h = jnp.concatenate([x, te], axis=-1)
    p_gen = jax.nn.sigmoid(
        jnp.einsum('bth,h->bt', h, p['fcg_w'][0], precision=PH)[..., None]
        + p['fcg_b'][0])
    logits = jnp.einsum('btc,cv->btv', x, p['fc2_w'], precision=PH) + p['fc2_b'][0]
    probs = jax.nn.softmax(logits, axis=-1) * p_gen
    onehot = jax.nn.one_hot(src_tokens, V, dtype=jnp.float32)
    copy_dist = jnp.einsum('bts,bsv->btv', copy_scores * (1.0 - p_gen), onehot,
                           precision=PH)
    return jnp.log(probs + copy_dist + 1e-32), avg_attn


# ----------------------------------------- main --------------------------------------
if __name__ == "__main__":
    key = jax.random.PRNGKey(0)
    k_par, k_emb, k_enc_a, k_enc_b, k_src = jax.random.split(key, 5)
    params = init_params(k_par)

    # prev_tokens_index: exactly T ones per row (positions selected from the GPT output)
    prev_tokens_index = jnp.zeros((B, T_CTX), jnp.int32)
    prev_tokens_index = prev_tokens_index.at[0, jnp.arange(1, T_CTX, 2)].set(1)
    prev_tokens_index = prev_tokens_index.at[1, jnp.arange(T_CTX - T, T_CTX)].set(1)

    # TODO(synk): share_embed_model.transformer (external GPT) and the output_lm_logits /
    # lm_head + log_softmax path have no in-script equivalent; `embed` stands in for the
    # GPT hidden states (B, T_CTX, D) and lm_logits is not produced.
    embed = jax.random.normal(k_emb, (B, T_CTX, D), jnp.float32)

    # glue: embed.view(-1, D)[prev_tokens_index.view(-1).eq(1)].view(B, -1, D)
    def gather_row(row_emb, row_idx):
        pos = jnp.where(row_idx == 1, jnp.arange(T_CTX), T_CTX)
        pos = jnp.sort(pos)[:T]
        return row_emb[pos]
    x_emb = jax.vmap(gather_row)(embed, prev_tokens_index)          # (B, T, D)

    # encoder outputs, padding mask (True = pad), source tokens
    encoder_a = jax.random.normal(k_enc_a, (B, S, D), jnp.float32)
    encoder_b = jax.random.normal(k_enc_b, (B, S, D), jnp.float32)
    src_lengths = jnp.array([S, S - 3])
    encoder_padding_mask = jnp.arange(S)[None, :] >= src_lengths[:, None]
    src_tokens = jax.random.randint(k_src, (B, S), 1, V).astype(jnp.int32)

    # glue: _split_encoder_out transpose
    enc_a_t = jnp.transpose(encoder_a, (0, 2, 1))                   # (B, D, S)

    # weight slab built ONCE (hoisted out of the per-call path)
    w_slab = pack_weights(params)

    out_log, avg_attn = gpt_fconv_decoder(x_emb, enc_a_t, encoder_b,
                                          encoder_padding_mask, src_tokens, w_slab)
    jax.block_until_ready((out_log, avg_attn))

    ref_log, ref_attn = reference_forward(x_emb, enc_a_t, encoder_b,
                                          encoder_padding_mask, src_tokens, params)
    assert out_log.shape == (B, T, V) and avg_attn.shape == (B, T, S)
    assert bool(jnp.allclose(out_log, ref_log, atol=3e-3, rtol=3e-3)), \
        float(jnp.max(jnp.abs(out_log - ref_log)))
    assert bool(jnp.allclose(avg_attn, ref_attn, atol=3e-3, rtol=3e-3)), \
        float(jnp.max(jnp.abs(avg_attn - ref_attn)))
    print("KERNEL_OK")
</pallas_src>

<mosaic_0001>
module attributes {stable_mosaic.version = 11 : i64} {
  func.func @decoder_kernel(%arg0: memref<112x128xf32, #tpu.memory_space<vmem>>, %arg1: memref<344x128xf32, #tpu.memory_space<vmem>>, %arg2: memref<16x256xf32, #tpu.memory_space<vmem>>) attributes {dimension_semantics = [], scalar_prefetch = 0 : i64, scratch_operands = 0 : i64, tpu.core_type = #tpu.core_type<tc>} {
    %c0 = arith.constant 0 : index
    %c0_0 = arith.constant 0 : index
    %0 = vector.load %arg0[%c0, %c0_0] : memref<112x128xf32, #tpu.memory_space<vmem>>, vector<16x32xf32>
    %c16 = arith.constant 16 : index
    %c0_1 = arith.constant 0 : index
    %1 = vector.load %arg0[%c16, %c0_1] : memref<112x128xf32, #tpu.memory_space<vmem>>, vector<32x20xf32>
    %c48 = arith.constant 48 : index
    %c0_2 = arith.constant 0 : index
    %2 = vector.load %arg0[%c48, %c0_2] : memref<112x128xf32, #tpu.memory_space<vmem>>, vector<20x32xf32>
    %c72 = arith.constant 72 : index
    %c0_3 = arith.constant 0 : index
    %3 = vector.load %arg0[%c72, %c0_3] : memref<112x128xf32, #tpu.memory_space<vmem>>, vector<16x20xf32>
    %c88 = arith.constant 88 : index
    %c0_4 = arith.constant 0 : index
    %4 = vector.load %arg0[%c88, %c0_4] : memref<112x128xf32, #tpu.memory_space<vmem>>, vector<20x128xf32>
    %cst = arith.constant dense<0.000000e+00> : vector<16xf32>
    %5 = vector.multi_reduction <add>, %0, %cst [1] : vector<16x32xf32> to vector<16xf32>
    %6 = vector.shape_cast %5 : vector<16xf32> to vector<16x1xf32>
    %cst_5 = arith.constant 3.200000e+01 : f32
    %7 = vector.broadcast %cst_5 : f32 to vector<16x1xf32>
    %8 = arith.divf %6, %7 : vector<16x1xf32>
    %9 = vector.broadcast %8 : vector<16x1xf32> to vector<16x32xf32>
    %10 = arith.subf %0, %9 : vector<16x32xf32>
    %11 = arith.mulf %10, %10 : vector<16x32xf32>
    %cst_6 = arith.constant dense<0.000000e+00> : vector<16xf32>
    %12 = vector.multi_reduction <add>, %11, %cst_6 [1] : vector<16x32xf32> to vector<16xf32>
    %13 = vector.shape_cast %12 : vector<16xf32> to vector<16x1xf32>
    %cst_7 = arith.constant 3.200000e+01 : f32
    %14 = vector.broadcast %cst_7 : f32 to vector<16x1xf32>
    %15 = arith.divf %13, %14 : vector<16x1xf32>
    %16 = vector.broadcast %8 : vector<16x1xf32> to vector<16x32xf32>
    %17 = arith.subf %0, %16 : vector<16x32xf32>
    %cst_8 = arith.constant 9.99999974E-6 : f32
    %18 = vector.broadcast %cst_8 : f32 to vector<16x1xf32>
    %19 = arith.addf %15, %18 : vector<16x1xf32>
    %20 = math.rsqrt %19 : vector<16x1xf32>
    %21 = vector.broadcast %20 : vector<16x1xf32> to vector<16x32xf32>
    %22 = arith.mulf %17, %21 : vector<16x32xf32>
    %c0_9 = arith.constant 0 : index
    %c0_10 = arith.constant 0 : index
    %23 = vector.load %arg1[%c0_9, %c0_10] : memref<344x128xf32, #tpu.memory_space<vmem>>, vector<1x32xf32>
    %24 = vector.broadcast %23 : vector<1x32xf32> to vector<16x32xf32>
    %25 = arith.mulf %22, %24 : vector<16x32xf32>
    %c8 = arith.constant 8 : index
    %c0_11 = arith.constant 0 : index
    %26 = vector.load %arg1[%c8, %c0_11] : memref<344x128xf32, #tpu.memory_space<vmem>>, vector<1x32xf32>
    %27 = vector.broadcast %26 : vector<1x32xf32> to vector<16x32xf32>
    %28 = arith.addf %25, %27 : vector<16x32xf32>
    %c16_12 = arith.constant 16 : index
    %c0_13 = arith.constant 0 : index
    %29 = vector.load %arg1[%c16_12, %c0_13] : memref<344x128xf32, #tpu.memory_space<vmem>>, vector<32x16xf32>
    %cst_14 = arith.constant dense<0.000000e+00> : vector<16x16xf32>
    %30 = tpu.matmul %28, %29, %cst_14 {dimension_numbers = #tpu.dot_dimension_numbers<[1], [0], [0], [1], [0, 0, 1, 1], [], []>} : vector<16x32xf32>, vector<32x16xf32>, vector<16x16xf32> -> vector<16x16xf32>
    %c48_15 = arith.constant 48 : index
    %c0_16 = arith.constant 0 : index
    %31 = vector.load %arg1[%c48_15, %c0_16] : memref<344x128xf32, #tpu.memory_space<vmem>>, vector<1x16xf32>
    %32 = vector.broadcast %31 : vector<1x16xf32> to vector<16x16xf32>
    %33 = arith.addf %30, %32 : vector<16x16xf32>
    %34 = tpu.iota {dimensions = array<i32: 0>} : vector<16x1xi32>
    %c8_i32 = arith.constant 8 : i32
    %c0_i32 = arith.constant 0 : i32
    %35 = arith.cmpi eq, %c8_i32, %c0_i32 : i32
    %c1_i32 = arith.constant 1 : i32
    %36 = arith.select %35, %c1_i32, %c8_i32 : i32
    %37 = vector.broadcast %36 : i32 to vector<16x1xi32>
    %38 = arith.remsi %34, %37 : vector<16x1xi32>
    %c0_i32_17 = arith.constant 0 : i32
    %39 = vector.broadcast %c0_i32_17 : i32 to vector<16x1xi32>
    %40 = arith.cmpi ne, %38, %39 : vector<16x1xi32>
    %c0_i32_18 = arith.constant 0 : i32
    %41 = vector.broadcast %c0_i32_18 : i32 to vector<16x1xi32>
    %42 = arith.cmpi slt, %38, %41 : vector<16x1xi32>
    %c0_i32_19 = arith.constant 0 : i32
    %43 = arith.cmpi slt, %36, %c0_i32_19 : i32
    %44 = vector.broadcast %43 : i1 to vector<16x1xi1>
    %45 = vector.broadcast %44 : vector<16x1xi1> to vector<16x1xi1>
    %46 = arith.xori %42, %45 : vector<16x1xi1>
    %47 = arith.andi %46, %40 : vector<16x1xi1>
    %48 = vector.broadcast %36 : i32 to vector<16x1xi32>
    %49 = arith.addi %38, %48 : vector<16x1xi32>
    %50 = arith.select %47, %49, %38 : vector<16x1xi1>, vector<16x1xi32>
    %cst_20 = arith.constant 0.000000e+00 : f32
    %51 = vector.broadcast %cst_20 : f32 to vector<16x20xf32>
    %c88_21 = arith.constant 88 : index
    %c0_22 = arith.constant 0 : index
    %52 = vector.load %arg1[%c88_21, %c0_22] : memref<344x128xf32, #tpu.memory_space<vmem>>, vector<16x32xf32>
    %cst_23 = arith.constant dense<0.000000e+00> : vector<16x32xf32>
    %53 = tpu.matmul %33, %52, %cst_23 {dimension_numbers = #tpu.dot_dimension_numbers<[1], [0], [0], [1], [0, 0, 1, 1], [], []>} : vector<16x16xf32>, vector<16x32xf32>, vector<16x32xf32> -> vector<16x32xf32>
    %c1_i32_24 = arith.constant 1 : i32
    %54 = vector.broadcast %c1_i32_24 : i32 to vector<16x1xi32>
    %55 = arith.cmpi sge, %50, %54 : vector<16x1xi32>
    %c1_i32_25 = arith.constant 1 : i32
    %56 = tpu.dynamic_rotate %33 by %c1_i32_25 dim 0 : vector<16x16xf32>, i32 -> vector<16x16xf32>
    %cst_26 = arith.constant 0.000000e+00 : f32
    %57 = vector.shape_cast %55 : vector<16x1xi1> to vector<16x1xi1>
    %58 = vector.broadcast %57 : vector<16x1xi1> to vector<16x16xi1>
    %59 = vector.broadcast %cst_26 : f32 to vector<16x16xf32>
    %60 = arith.select %58, %56, %59 : vector<16x16xi1>, vector<16x16xf32>
    %c72_27 = arith.constant 72 : index
    %c0_28 = arith.constant 0 : index
    %61 = vector.load %arg1[%c72_27, %c0_28] : memref<344x128xf32, #tpu.memory_space<vmem>>, vector<16x32xf32>
    %cst_29 = arith.constant dense<0.000000e+00> : vector<16x32xf32>
    %62 = tpu.matmul %60, %61, %cst_29 {dimension_numbers = #tpu.dot_dimension_numbers<[1], [0], [0], [1], [0, 0, 1, 1], [], []>} : vector<16x16xf32>, vector<16x32xf32>, vector<16x32xf32> -> vector<16x32xf32>
    %63 = arith.addf %53, %62 : vector<16x32xf32>
    %c2_i32 = arith.constant 2 : i32
    %64 = vector.broadcast %c2_i32 : i32 to vector<16x1xi32>
    %65 = arith.cmpi sge, %50, %64 : vector<16x1xi32>
    %c2_i32_30 = arith.constant 2 : i32
    %66 = tpu.dynamic_rotate %33 by %c2_i32_30 dim 0 : vector<16x16xf32>, i32 -> vector<16x16xf32>
    %cst_31 = arith.constant 0.000000e+00 : f32
    %67 = vector.shape_cast %65 : vector<16x1xi1> to vector<16x1xi1>
    %68 = vector.broadcast %67 : vector<16x1xi1> to vector<16x16xi1>
    %69 = vector.broadcast %cst_31 : f32 to vector<16x16xf32>
    %70 = arith.select %68, %66, %69 : vector<16x16xi1>, vector<16x16xf32>
    %c56 = arith.constant 56 : index
    %c0_32 = arith.constant 0 : index
    %71 = vector.load %arg1[%c56, %c0_32] : memref<344x128xf32, #tpu.memory_space<vmem>>, vector<16x32xf32>
    %cst_33 = arith.constant dense<0.000000e+00> : vector<16x32xf32>
    %72 = tpu.matmul %70, %71, %cst_33 {dimension_numbers = #tpu.dot_dimension_numbers<[1], [0], [0], [1], [0, 0, 1, 1], [], []>} : vector<16x16xf32>, vector<16x32xf32>, vector<16x32xf32> -> vector<16x32xf32>
    %73 = arith.addf %63, %72 : vector<16x32xf32>
    %c104 = arith.constant 104 : index
    %c0_34 = arith.constant 0 : index
    %74 = vector.load %arg1[%c104, %c0_34] : memref<344x128xf32, #tpu.memory_space<vmem>>, vector<1x32xf32>
    %75 = vector.broadcast %74 : vector<1x32xf32> to vector<16x32xf32>
    %76 = arith.addf %73, %75 : vector<16x32xf32>
    %77 = vector.extract_strided_slice %76 {offsets = [0, 0], sizes = [16, 16], strides = [1, 1]} : vector<16x32xf32> to vector<16x16xf32>
    %78 = vector.extract_strided_slice %76 {offsets = [0, 16], sizes = [16, 16], strides = [1, 1]} : vector<16x32xf32> to vector<16x16xf32>
    %79 = arith.negf %78 : vector<16x16xf32>
    %80 = math.exp %79 : vector<16x16xf32>
    %cst_35 = arith.constant 1.000000e+00 : f32
    %81 = vector.broadcast %cst_35 : f32 to vector<16x16xf32>
    %82 = arith.addf %81, %80 : vector<16x16xf32>
    %83 = arith.divf %81, %82 : vector<16x16xf32>
    %84 = arith.mulf %77, %83 : vector<16x16xf32>
    %c112 = arith.constant 112 : index
    %c0_36 = arith.constant 0 : index
    %85 = vector.load %arg1[%c112, %c0_36] : memref<344x128xf32, #tpu.memory_space<vmem>>, vector<16x32xf32>
    %cst_37 = arith.constant dense<0.000000e+00> : vector<16x32xf32>
    %86 = tpu.matmul %84, %85, %cst_37 {dimension_numbers = #tpu.dot_dimension_numbers<[1], [0], [0], [1], [0, 0, 1, 1], [], []>} : vector<16x16xf32>, vector<16x32xf32>, vector<16x32xf32> -> vector<16x32xf32>
    %c128 = arith.constant 128 : index
    %c0_38 = arith.constant 0 : index
    %87 = vector.load %arg1[%c128, %c0_38] : memref<344x128xf32, #tpu.memory_space<vmem>>, vector<1x32xf32>
    %88 = vector.broadcast %87 : vector<1x32xf32> to vector<16x32xf32>
    %89 = arith.addf %86, %88 : vector<16x32xf32>
    %90 = arith.addf %89, %28 : vector<16x32xf32>
    %cst_39 = arith.constant 0.707106769 : f32
    %91 = vector.broadcast %cst_39 : f32 to vector<16x32xf32>
    %92 = arith.mulf %90, %91 : vector<16x32xf32>
    %cst_40 = arith.constant dense<0.000000e+00> : vector<16x20xf32>
    %93 = tpu.matmul %92, %1, %cst_40 {dimension_numbers = #tpu.dot_dimension_numbers<[1], [0], [0], [1], [0, 0, 1, 1], [], []>} : vector<16x32xf32>, vector<32x20xf32>, vector<16x20xf32> -> vector<16x20xf32>
    %94 = arith.addf %93, %3 : vector<16x20xf32>
    %cst_41 = arith.constant dense<0xFF800000> : vector<16xf32>
    %95 = vector.multi_reduction <maximumf>, %94, %cst_41 [1] : vector<16x20xf32> to vector<16xf32>
    %96 = vector.shape_cast %95 : vector<16xf32> to vector<16x1xf32>
    %97 = vector.broadcast %96 : vector<16x1xf32> to vector<16x20xf32>
    %98 = arith.subf %94, %97 : vector<16x20xf32>
    %99 = math.exp %98 : vector<16x20xf32>
    %cst_42 = arith.constant dense<0.000000e+00> : vector<16xf32>
    %100 = vector.multi_reduction <add>, %99, %cst_42 [1] : vector<16x20xf32> to vector<16xf32>
    %101 = vector.shape_cast %100 : vector<16xf32> to vector<16x1xf32>
    %102 = vector.broadcast %101 : vector<16x1xf32> to vector<16x20xf32>
    %103 = arith.divf %99, %102 : vector<16x20xf32>
    %cst_43 = arith.constant 5.000000e-01 : f32
    %104 = vector.broadcast %cst_43 : f32 to vector<16x20xf32>
    %105 = arith.mulf %103, %104 : vector<16x20xf32>
    %106 = arith.addf %51, %105 : vector<16x20xf32>
    %cst_44 = arith.constant dense<0.000000e+00> : vector<16x32xf32>
    %107 = tpu.matmul %103, %2, %cst_44 {dimension_numbers = #tpu.dot_dimension_numbers<[1], [0], [0], [1], [0, 0, 1, 1], [], []>} : vector<16x20xf32>, vector<20x32xf32>, vector<16x32xf32> -> vector<16x32xf32>
    %cst_45 = arith.constant 3.1622777 : f32
    %108 = vector.broadcast %cst_45 : f32 to vector<16x32xf32>
    %109 = arith.mulf %107, %108 : vector<16x32xf32>
    %c136 = arith.constant 136 : index
    %c0_46 = arith.constant 0 : index
    %110 = vector.load %arg1[%c136, %c0_46] : memref<344x128xf32, #tpu.memory_space<vmem>>, vector<32x16xf32>
    %cst_47 = arith.constant dense<0.000000e+00> : vector<16x16xf32>
    %111 = tpu.matmul %109, %110, %cst_47 {dimension_numbers = #tpu.dot_dimension_numbers<[1], [0], [0], [1], [0, 0, 1, 1], [], []>} : vector<16x32xf32>, vector<32x16xf32>, vector<16x16xf32> -> vector<16x16xf32>
    %c168 = arith.constant 168 : index
    %c0_48 = arith.constant 0 : index
    %112 = vector.load %arg1[%c168, %c0_48] : memref<344x128xf32, #tpu.memory_space<vmem>>, vector<1x16xf32>
    %113 = vector.broadcast %112 : vector<1x16xf32> to vector<16x16xf32>
    %114 = arith.addf %111, %113 : vector<16x16xf32>
    %115 = arith.addf %114, %84 : vector<16x16xf32>
    %cst_49 = arith.constant 0.707106769 : f32
    %116 = vector.broadcast %cst_49 : f32 to vector<16x16xf32>
    %117 = arith.mulf %115, %116 : vector<16x16xf32>
    %c208 = arith.constant 208 : index
    %c0_50 = arith.constant 0 : index
    %118 = vector.load %arg1[%c208, %c0_50] : memref<344x128xf32, #tpu.memory_space<vmem>>, vector<16x32xf32>
    %cst_51 = arith.constant dense<0.000000e+00> : vector<16x32xf32>
    %119 = tpu.matmul %117, %118, %cst_51 {dimension_numbers = #tpu.dot_dimension_numbers<[1], [0], [0], [1], [0, 0, 1, 1], [], []>} : vector<16x16xf32>, vector<16x32xf32>, vector<16x32xf32> -> vector<16x32xf32>
    %c1_i32_52 = arith.constant 1 : i32
    %120 = vector.broadcast %c1_i32_52 : i32 to vector<16x1xi32>
    %121 = arith.cmpi sge, %50, %120 : vector<16x1xi32>
    %c1_i32_53 = arith.constant 1 : i32
    %122 = tpu.dynamic_rotate %117 by %c1_i32_53 dim 0 : vector<16x16xf32>, i32 -> vector<16x16xf32>
    %cst_54 = arith.constant 0.000000e+00 : f32
    %123 = vector.shape_cast %121 : vector<16x1xi1> to vector<16x1xi1>
    %124 = vector.broadcast %123 : vector<16x1xi1> to vector<16x16xi1>
    %125 = vector.broadcast %cst_54 : f32 to vector<16x16xf32>
    %126 = arith.select %124, %122, %125 : vector<16x16xi1>, vector<16x16xf32>
    %c192 = arith.constant 192 : index
    %c0_55 = arith.constant 0 : index
    %127 = vector.load %arg1[%c192, %c0_55] : memref<344x128xf32, #tpu.memory_space<vmem>>, vector<16x32xf32>
    %cst_56 = arith.constant dense<0.000000e+00> : vector<16x32xf32>
    %128 = tpu.matmul %126, %127, %cst_56 {dimension_numbers = #tpu.dot_dimension_numbers<[1], [0], [0], [1], [0, 0, 1, 1], [], []>} : vector<16x16xf32>, vector<16x32xf32>, vector<16x32xf32> -> vector<16x32xf32>
    %129 = arith.addf %119, %128 : vector<16x32xf32>
    %c2_i32_57 = arith.constant 2 : i32
    %130 = vector.broadcast %c2_i32_57 : i32 to vector<16x1xi32>
    %131 = arith.cmpi sge, %50, %130 : vector<16x1xi32>
    %c2_i32_58 = arith.constant 2 : i32
    %132 = tpu.dynamic_rotate %117 by %c2_i32_58 dim 0 : vector<16x16xf32>, i32 -> vector<16x16xf32>
    %cst_59 = arith.constant 0.000000e+00 : f32
    %133 = vector.shape_cast %131 : vector<16x1xi1> to vector<16x1xi1>
    %134 = vector.broadcast %133 : vector<16x1xi1> to vector<16x16xi1>
    %135 = vector.broadcast %cst_59 : f32 to vector<16x16xf32>
    %136 = arith.select %134, %132, %135 : vector<16x16xi1>, vector<16x16xf32>
    %c176 = arith.constant 176 : index
    %c0_60 = arith.constant 0 : index
    %137 = vector.load %arg1[%c176, %c0_60] : memref<344x128xf32, #tpu.memory_space<vmem>>, vector<16x32xf32>
    %cst_61 = arith.constant dense<0.000000e+00> : vector<16x32xf32>
    %138 = tpu.matmul %136, %137, %cst_61 {dimension_numbers = #tpu.dot_dimension_numbers<[1], [0], [0], [1], [0, 0, 1, 1], [], []>} : vector<16x16xf32>, vector<16x32xf32>, vector<16x32xf32> -> vector<16x32xf32>
    %139 = arith.addf %129, %138 : vector<16x32xf32>
    %c224 = arith.constant 224 : index
    %c0_62 = arith.constant 0 : index
    %140 = vector.load %arg1[%c224, %c0_62] : memref<344x128xf32, #tpu.memory_space<vmem>>, vector<1x32xf32>
    %141 = vector.broadcast %140 : vector<1x32xf32> to vector<16x32xf32>
    %142 = arith.addf %139, %141 : vector<16x32xf32>
    %143 = vector.extract_strided_slice %142 {offsets = [0, 0], sizes = [16, 16], strides = [1, 1]} : vector<16x32xf32> to vector<16x16xf32>
    %144 = vector.extract_strided_slice %142 {offsets = [0, 16], sizes = [16, 16], strides = [1, 1]} : vector<16x32xf32> to vector<16x16xf32>
    %145 = arith.negf %144 : vector<16x16xf32>
    %146 = math.exp %145 : vector<16x16xf32>
    %cst_63 = arith.constant 1.000000e+00 : f32
    %147 = vector.broadcast %cst_63 : f32 to vector<16x16xf32>
    %148 = arith.addf %147, %146 : vector<16x16xf32>
    %149 = arith.divf %147, %148 : vector<16x16xf32>
    %150 = arith.mulf %143, %149 : vector<16x16xf32>
    %c232 = arith.constant 232 : index
    %c0_64 = arith.constant 0 : index
    %151 = vector.load %arg1[%c232, %c0_64] : memref<344x128xf32, #tpu.memory_space<vmem>>, vector<16x32xf32>
    %cst_65 = arith.constant dense<0.000000e+00> : vector<16x32xf32>
    %152 = tpu.matmul %150, %151, %cst_65 {dimension_numbers = #tpu.dot_dimension_numbers<[1], [0], [0], [1], [0, 0, 1, 1], [], []>} : vector<16x16xf32>, vector<16x32xf32>, vector<16x32xf32> -> vector<16x32xf32>
    %c248 = arith.constant 248 : index
    %c0_66 = arith.constant 0 : index
    %153 = vector.load %arg1[%c248, %c0_66] : memref<344x128xf32, #tpu.memory_space<vmem>>, vector<1x32xf32>
    %154 = vector.broadcast %153 : vector<1x32xf32> to vector<16x32xf32>
    %155 = arith.addf %152, %154 : vector<16x32xf32>
    %156 = arith.addf %155, %28 : vector<16x32xf32>
    %cst_67 = arith.constant 0.707106769 : f32
    %157 = vector.broadcast %cst_67 : f32 to vector<16x32xf32>
    %158 = arith.mulf %156, %157 : vector<16x32xf32>
    %cst_68 = arith.constant dense<0.000000e+00> : vector<16x20xf32>
    %159 = tpu.matmul %158, %1, %cst_68 {dimension_numbers = #tpu.dot_dimension_numbers<[1], [0], [0], [1], [0, 0, 1, 1], [], []>} : vector<16x32xf32>, vector<32x20xf32>, vector<16x20xf32> -> vector<16x20xf32>
    %160 = arith.addf %159, %3 : vector<16x20xf32>
    %cst_69 = arith.constant dense<0xFF800000> : vector<16xf32>
    %161 = vector.multi_reduction <maximumf>, %160, %cst_69 [1] : vector<16x20xf32> to vector<16xf32>
    %162 = vector.shape_cast %161 : vector<16xf32> to vector<16x1xf32>
    %163 = vector.broadcast %162 : vector<16x1xf32> to vector<16x20xf32>
    %164 = arith.subf %160, %163 : vector<16x20xf32>
    %165 = math.exp %164 : vector<16x20xf32>
    %cst_70 = arith.constant dense<0.000000e+00> : vector<16xf32>
    %166 = vector.multi_reduction <add>, %165, %cst_70 [1] : vector<16x20xf32> to vector<16xf32>
    %167 = vector.shape_cast %166 : vector<16xf32> to vector<16x1xf32>
    %168 = vector.broadcast %167 : vector<16x1xf32> to vector<16x20xf32>
    %169 = arith.divf %165, %168 : vector<16x20xf32>
    %cst_71 = arith.constant 5.000000e-01 : f32
    %170 = vector.broadcast %cst_71 : f32 to vector<16x20xf32>
    %171 = arith.mulf %169, %170 : vector<16x20xf32>
    %172 = arith.addf %106, %171 : vector<16x20xf32>
    %cst_72 = arith.constant dense<0.000000e+00> : vector<16x32xf32>
    %173 = tpu.matmul %169, %2, %cst_72 {dimension_numbers = #tpu.dot_dimension_numbers<[1], [0], [0], [1], [0, 0, 1, 1], [], []>} : vector<16x20xf32>, vector<20x32xf32>, vector<16x32xf32> -> vector<16x32xf32>
    %cst_73 = arith.constant 3.1622777 : f32
    %174 = vector.broadcast %cst_73 : f32 to vector<16x32xf32>
    %175 = arith.mulf %173, %174 : vector<16x32xf32>
    %c256 = arith.constant 256 : index
    %c0_74 = arith.constant 0 : index
    %176 = vector.load %arg1[%c256, %c0_74] : memref<344x128xf32, #tpu.memory_space<vmem>>, vector<32x16xf32>
    %cst_75 = arith.constant dense<0.000000e+00> : vector<16x16xf32>
    %177 = tpu.matmul %175, %176, %cst_75 {dimension_numbers = #tpu.dot_dimension_numbers<[1], [0], [0], [1], [0, 0, 1, 1], [], []>} : vector<16x32xf32>, vector<32x16xf32>, vector<16x16xf32> -> vector<16x16xf32>
    %c288 = arith.constant 288 : index
    %c0_76 = arith.constant 0 : index
    %178 = vector.load %arg1[%c288, %c0_76] : memref<344x128xf32, #tpu.memory_space<vmem>>, vector<1x16xf32>
    %179 = vector.broadcast %178 : vector<1x16xf32> to vector<16x16xf32>
    %180 = arith.addf %177, %179 : vector<16x16xf32>
    %181 = arith.addf %180, %150 : vector<16x16xf32>
    %cst_77 = arith.constant 0.707106769 : f32
    %182 = vector.broadcast %cst_77 : f32 to vector<16x16xf32>
    %183 = arith.mulf %181, %182 : vector<16x16xf32>
    %c296 = arith.constant 296 : index
    %c0_78 = arith.constant 0 : index
    %184 = vector.load %arg1[%c296, %c0_78] : memref<344x128xf32, #tpu.memory_space<vmem>>, vector<1x16xf32>
    %185 = vector.broadcast %184 : vector<1x16xf32> to vector<16x16xf32>
    %186 = arith.mulf %183, %185 : vector<16x16xf32>
    %cst_79 = arith.constant dense<0.000000e+00> : vector<16xf32>
    %187 = vector.multi_reduction <add>, %186, %cst_79 [1] : vector<16x16xf32> to vector<16xf32>
    %188 = vector.shape_cast %187 : vector<16xf32> to vector<16x1xf32>
    %c304 = arith.constant 304 : index
    %c0_80 = arith.constant 0 : index
    %189 = vector.load %arg1[%c304, %c0_80] : memref<344x128xf32, #tpu.memory_space<vmem>>, vector<1x32xf32>
    %190 = vector.broadcast %189 : vector<1x32xf32> to vector<16x32xf32>
    %191 = arith.mulf %28, %190 : vector<16x32xf32>
    %cst_81 = arith.constant dense<0.000000e+00> : vector<16xf32>
    %192 = vector.multi_reduction <add>, %191, %cst_81 [1] : vector<16x32xf32> to vector<16xf32>
    %193 = vector.shape_cast %192 : vector<16xf32> to vector<16x1xf32>
    %194 = arith.addf %188, %193 : vector<16x1xf32>
    %c312 = arith.constant 312 : index
    %c0_82 = arith.constant 0 : index
    %195 = vector.load %arg1[%c312, %c0_82] : memref<344x128xf32, #tpu.memory_space<vmem>>, vector<1x1xf32>
    %196 = vector.broadcast %195 : vector<1x1xf32> to vector<16x1xf32>
    %197 = arith.addf %194, %196 : vector<16x1xf32>
    %198 = arith.negf %197 : vector<16x1xf32>
    %199 = math.exp %198 : vector<16x1xf32>
    %cst_83 = arith.constant 1.000000e+00 : f32
    %200 = vector.broadcast %cst_83 : f32 to vector<16x1xf32>
    %201 = arith.addf %200, %199 : vector<16x1xf32>
    %202 = arith.divf %200, %201 : vector<16x1xf32>
    %c320 = arith.constant 320 : index
    %c0_84 = arith.constant 0 : index
    %203 = vector.load %arg1[%c320, %c0_84] : memref<344x128xf32, #tpu.memory_space<vmem>>, vector<16x128xf32>
    %cst_85 = arith.constant dense<0.000000e+00> : vector<16x128xf32>
    %204 = tpu.matmul %183, %203, %cst_85 {dimension_numbers = #tpu.dot_dimension_numbers<[1], [0], [0], [1], [0, 0, 1, 1], [], []>} : vector<16x16xf32>, vector<16x128xf32>, vector<16x128xf32> -> vector<16x128xf32>
    %c336 = arith.constant 336 : index
    %c0_86 = arith.constant 0 : index
    %205 = vector.load %arg1[%c336, %c0_86] : memref<344x128xf32, #tpu.memory_space<vmem>>, vector<1x128xf32>
    %206 = vector.broadcast %205 : vector<1x128xf32> to vector<16x128xf32>
    %207 = arith.addf %204, %206 : vector<16x128xf32>
    %cst_87 = arith.constant dense<0xFF800000> : vector<16xf32>
    %208 = vector.multi_reduction <maximumf>, %207, %cst_87 [1] : vector<16x128xf32> to vector<16xf32>
    %209 = vector.shape_cast %208 : vector<16xf32> to vector<16x1xf32>
    %210 = vector.broadcast %209 : vector<16x1xf32> to vector<16x128xf32>
    %211 = arith.subf %207, %210 : vector<16x128xf32>
    %212 = math.exp %211 : vector<16x128xf32>
    %cst_88 = arith.constant dense<0.000000e+00> : vector<16xf32>
    %213 = vector.multi_reduction <add>, %212, %cst_88 [1] : vector<16x128xf32> to vector<16xf32>
    %214 = vector.shape_cast %213 : vector<16xf32> to vector<16x1xf32>
    %215 = vector.broadcast %214 : vector<16x1xf32> to vector<16x128xf32>
    %216 = arith.divf %212, %215 : vector<16x128xf32>
    %217 = vector.broadcast %202 : vector<16x1xf32> to vector<16x128xf32>
    %218 = arith.mulf %216, %217 : vector<16x128xf32>
    %cst_89 = arith.constant 1.000000e+00 : f32
    %219 = vector.broadcast %cst_89 : f32 to vector<16x1xf32>
    %220 = arith.subf %219, %202 : vector<16x1xf32>
    %221 = vector.broadcast %220 : vector<16x1xf32> to vector<16x20xf32>
    %222 = arith.mulf %169, %221 : vector<16x20xf32>
    %cst_90 = arith.constant dense<0.000000e+00> : vector<16x128xf32>
    %223 = tpu.matmul %222, %4, %cst_90 {dimension_numbers = #tpu.dot_dimension_numbers<[1], [0], [0], [1], [0, 0, 1, 1], [], []>} : vector<16x20xf32>, vector<20x128xf32>, vector<16x128xf32> -> vector<16x128xf32>
    %224 = arith.addf %218, %223 : vector<16x128xf32>
    %cst_91 = arith.constant 1.000000e-32 : f32
    %225 = vector.broadcast %cst_91 : f32 to vector<16x128xf32>
    %226 = arith.addf %224, %225 : vector<16x128xf32>
    %227 = math.log %226 : vector<16x128xf32>
    %cst_92 = arith.constant 0.000000e+00 : f32
    %228 = vector.broadcast %cst_92 : f32 to vector<16x108xf32>
    %229 = tpu.concatenate %227, %172, %228 in 1 : vector<16x128xf32>, vector<16x20xf32>, vector<16x108xf32> -> vector<16x256xf32>
    %c0_93 = arith.constant 0 : index
    %c0_94 = arith.constant 0 : index
    %230 = vector.load %arg2[%c0_93, %c0_94] : memref<16x256xf32, #tpu.memory_space<vmem>>, vector<16x256xf32>
    tpu.vector_store %arg2[%c0_93, %c0_94], %229 {strides = array<i32>} : memref<16x256xf32, #tpu.memory_space<vmem>>, vector<16x256xf32>,
    return
  }
}

</mosaic_0001>

<bundles_post_ra>
// kernel: ne.11
= control target key start
LH: loop header
LB: loop body
LE: loop exit
PB: predicated region body
PF: predicated region fallthrough
CT: control target
= control target key end

     0   :  { %vm7_vm0 = vcmask 80896   ;;  %vm13_vm1 = vcmask 162896   ;;  %s39_s0 = inlined_call_operand.vmem [shape: s32[2,10], index: 0, kind: input, shape index: {}]   ;;  %s40_s1 = inlined_call_operand.vmem [shape: s32[20], index: 1, kind: output, shape index: {}]  }
   0x1   :  { %v4_v0 = vld [vmem:[%s39_s0] sm:$0x3]  ;;  %s22_s0 = smov 10  }
   0x2   :  { %5 = vst [vmem:[#allocation1] sm:$0x3] %v4_v0 }
   0x9   :  { %v10_v1 = vld [vmem:[#allocation1 + $0x1] sm:$0x1]   ;;  %v6_v2 = vld [vmem:[#allocation1] sm:$0x1]  }
   0xa   :  { %11 = vrot.lane.b32.xlu0 %v10_v1, %s22_s0  ;;  %8 = vst.msk [vmem:[#allocation0] sm:$0x1] %vm7_vm0, %v6_v2  }
  0x7c   :  { %v12_v3 = vpop.permute.xlu0 %11  }
  0x7d   :  { %14 = vst.msk [vmem:[#allocation0] sm:$0x1] %vm13_vm1, %v12_v3  }
  0x84   :  { %v18_v4 = vld [vmem:[#allocation0] sm:$0x1] }
  0x85   :  { %20 = vst [vmem:[%s40_s1] sm:$0x1] %v18_v4 }

// kernel: ne.8
= control target key start
LH: loop header
LB: loop body
LE: loop exit
PB: predicated region body
PF: predicated region fallthrough
CT: control target
= control target key end

     0   :  { %vm7_vm0 = vcmask 64512   ;;  %vm13_vm1 = vcmask 130112   ;;  %s39_s0 = inlined_call_operand.vmem [shape: s32[2,8], index: 0, kind: input, shape index: {}]   ;;  %s40_s1 = inlined_call_operand.vmem [shape: s32[16], index: 1, kind: output, shape index: {}]  }
   0x1   :  { %v4_v0 = vld [vmem:[%s39_s0] sm:$0x3]  ;;  %s22_s0 = smov 8  }
   0x2   :  { %5 = vst [vmem:[#allocation1] sm:$0x3] %v4_v0 }
   0x9   :  { %v10_v1 = vld [vmem:[#allocation1 + $0x1] sm:$0x1]   ;;  %v6_v2 = vld [vmem:[#allocation1] sm:$0x1]  }
   0xa   :  { %11 = vrot.lane.b32.xlu0 %v10_v1, %s22_s0  ;;  %8 = vst.msk [vmem:[#allocation0] sm:$0x1] %vm7_vm0, %v6_v2  }
  0x7c   :  { %v12_v3 = vpop.permute.xlu0 %11  }
  0x7d   :  { %14 = vst.msk [vmem:[#allocation0] sm:$0x1] %vm13_vm1, %v12_v3  }
  0x84   :  { %v18_v4 = vld [vmem:[#allocation0] sm:$0x1] }
  0x85   :  { %20 = vst [vmem:[%s40_s1] sm:$0x1] %v18_v4 }

// kernel: gpt_fconv_decoder.1
= control target key start
LH: loop header
LB: loop body
LE: loop exit
PB: predicated region body
PF: predicated region fallthrough
CT: control target
= control target key end

     0   :  { %vm25_vm0 = vcmask 261120   ;;  %v157_v42 = vlaneseq  ;;  %vm201_vm5 = vcmask 130048   ;;  %s2259_s17 = smov 112   ;;  %vm664_vm8 = vcmask 162816   ;;  %s2653_s0 = inlined_call_operand.vmem [shape: f32[112,128], index: 0, kind: input, shape index: {}]   ;;  %s2654_s1 = inlined_call_operand.vmem [shape: f32[344,128], index: 1, kind: input, shape index: {}]   ;;  %s2655_s2 = inlined_call_operand.vmem [shape: f32[16,256], index: 2, kind: output, shape index: {}]  }
   0x1   :  { %v11_v0 = vld [vmem:[%s2653_s0] sm:$0xff]  ;;  %v12_v1 = vld [vmem:[%s2653_s0 + $0x8] sm:$0xff]  ;;  %v67_v14 = vld [vmem:[%s2654_s1 + $0x10] sm:$0xff]  ;;  %vm697_vm9 = vcmask 1043456  }
   0x2   :  { %v26_v2 = vsel %vm25_vm0, %v11_v0, 0.0  ;;  %v29_v3 = vsel %vm25_vm0, %v12_v1, 0.0  ;;  %v68_v15 = vld [vmem:[%s2654_s1 + $0x18] sm:$0xff]  ;;  %v69_v16 = vld [vmem:[%s2654_s1 + $0x20] sm:$0xff]  ;;  %v70_v18 = vld [vmem:[%s2654_s1 + $0x28] sm:$0xff]  ;;  %v2324_v43 = vshrl.u32 %v157_v42, 7 }
   0x3   :  { %27 = vadd.xlane.f32.xlu0 %v26_v2  ;;  %v2103_v17 = vpack.c.bf16 %v68_v15, %v67_v14  ;;  %v2107_v19 = vpack.c.bf16 %v70_v18, %v69_v16  ;;  %v1821_v27 = vld [vmem:[%s2654_s1] ss:$0 sm:$0xff]  ;;  %v1822_v29 = vld [vmem:[%s2654_s1 + $0x8] ss:$0 sm:$0xff]  ;;  %v200_v37 = vld [vmem:[%s2654_s1 + $0x50] sm:$0xff] }
   0x4   :  { %v199_v36 = vld [vmem:[%s2654_s1 + $0x48] sm:$0xff]  ;;  %v184_v39 = vld [vmem:[%s2654_s1 + $0x58] sm:$0xff]  ;;  %v185_v40 = vld [vmem:[%s2654_s1 + $0x60] sm:$0xff]  ;;  %v159_v44 = vadd.s32 8, %v2324_v43  ;;  %v164_v47 = vand.u32 7, %v2324_v43  ;;  %vm190_vm1 = vcmp.lt.s32.totalorder %v2324_v43, 1 }
   0x5   :  { %2104 = vmatprep.subr.bf16.mxu0 %v2103_v17  ;;  %v2111_v38 = vpack.c.bf16 %v200_v37, %v199_v36  ;;  %v2115_v41 = vpack.c.bf16 %v185_v40, %v184_v39  ;;  %v1823_v45 = vld [vmem:[%s2654_s1 + $0x30] ss:$0 sm:$0xff]  ;;  %vm368_vm2 = vcmp.lt.s32.totalorder %v2324_v43, 2  ;;  %v377_v58 = vld [vmem:[%s2654_s1 + $0x38] sm:$0xff]  ;;  %v378_v59 = vld [vmem:[%s2654_s1 + $0x40] sm:$0xff] }
   0x6   :  { %2106 = vmatpush3.bf16.msra.mxu0 %v2103_v17  ;;  %v171_v48 = vand.u32 7, %v159_v44  ;;  %vm2333_vm3 = vcmp.ge.s32.totalorder %v164_v47, 1  ;;  %v2119_v2 = vpack.c.bf16 %v378_v59, %v377_v58  ;;  %vm2362_vm6 = vcmp.ge.s32.totalorder %v164_v47, 2  ;;  %v1164_v57 = vld [vmem:[%s2654_s1 + $0xe8] sm:$0xff] }
   0x7   :  { %30 = vadd.xlane.f32.xlu0 %v29_v3  ;;  %2108 = vmatprep.subr.bf16.mxu0 %v2107_v19  ;;  %v1165_v3 = vld [vmem:[%s2654_s1 + $0xf0] sm:$0xff] }
   0x8   :  { %2112 = vmatprep.subr.bf16.mxu1 %v2111_v38  ;;  %vm2337_vm4 = vcmp.ge.s32.totalorder %v171_v48, 1  ;;  %vm2370_vm7 = vcmp.ge.s32.totalorder %v171_v48, 2 }
   0x9   :  { %2114 = vmatpush3.bf16.msra.mxu1 %v2111_v38 }
   0xa   :  { %2110 = vmatpush3.bf16.msra.mxu0 %v2107_v19  ;;  %2116 = vmatprep.subr.bf16.mxu1 %v2115_v41 }
  0x90   :  { %v28_v4 = vpop.xlane.xlu0 %27 }
  0x91   :  { %v33_v5 = vmul.f32 0.03125, %v28_v4 }
  0x93   :  { %v35_v6 = vsub.f32 %v11_v0, %v33_v5  ;;  %v2159_v5 = vpack.c.bf16 %v1165_v3, %v1164_v57 }
  0x94   :  { %v31_v7 = vpop.xlane.xlu0 %30 }
  0x95   :  { %v34_v8 = vmul.f32 0.03125, %v31_v7  ;;  %v37_v9 = vmul.f32 %v35_v6, %v35_v6  ;;  %v491_v7 = vld [vmem:[%s2654_s1 + $0x70] sm:$0xff] }
  0x97   :  { %v36_v10 = vsub.f32 %v12_v1, %v34_v8  ;;  %v39_v11 = vsel %vm25_vm0, %v37_v9, 0.0  ;;  %v492_v8 = vld [vmem:[%s2654_s1 + $0x78] sm:$0xff] }
  0x98   :  { %40 = vadd.xlane.f32.xlu1 %v39_v11  ;;  %v2123_v9 = vpack.c.bf16 %v492_v8, %v491_v7  ;;  %v778_v7 = vld [vmem:[%s2654_s1 + $0x88] sm:$0xff]  ;;  %v779_v8 = vld [vmem:[%s2654_s1 + $0x90] sm:$0xff] }
  0x99   :  { %v38_v12 = vmul.f32 %v36_v10, %v36_v10 }
  0x9a   :  { %2124 = vmatprep.subr.bf16.mxu0 %v2123_v9 }
  0x9b   :  { %v42_v13 = vsel %vm25_vm0, %v38_v12, 0.0 }
  0x9c   :  { %43 = vadd.xlane.f32.xlu1 %v42_v13 }
 0x125   :  { %v41_v20 = vpop.xlane.xlu1 %40 }
 0x126   :  { %v45_v21 = vmul.f32 0.03125, %v41_v20 }
 0x128   :  { %v47_v22 = vadd.f32 1e-05, %v45_v21 }
 0x129   :  { %v44_v23 = vpop.xlane.xlu1 %43 }
 0x12a   :  { %2203 = vrsqrt.f32 %v47_v22  ;;  %v46_v24 = vmul.f32 0.03125, %v44_v23 }
 0x12c   :  { %v48_v25 = vadd.f32 1e-05, %v46_v24 }
 0x12e   :  { %2205 = vrsqrt.f32 %v48_v25 }
 0x134   :  { %v2204_v26 = vpop.eup %2203 }
 0x135   :  { %v51_v28 = vmul.f32 %v2204_v26, %v35_v6 }
 0x137   :  { %v58_v30 = vmul.f32 %v1821_v27, %v51_v28  ;;  %v14_v28 = vld [vmem:[%s2653_s0 + $0x18] sm:$0xff] }
 0x138   :  { %v2206_v31 = vpop.eup %2205 }
 0x139   :  { %v2304_v32 = vadd.f32 %v1822_v29, %v58_v30  ;;  %v52_v33 = vmul.f32 %v2206_v31, %v36_v10  ;;  %v1832_v10 = vld [vmem:[%s2654_s1 + $0x68] ss:$0 sm:$0xff]  ;;  %v15_v30 = vld [vmem:[%s2653_s0 + $0x20] sm:$0xff] }
 0x13a   :  { %v16_v31 = vld [vmem:[%s2653_s0 + $0x28] sm:$0xff] }
 0x13b   :  { %1966 = vmatprep.mubr.msk.f32.mxu0 %vm25_vm0, %v2304_v32  ;;  %v59_v34 = vmul.f32 %v1821_v27, %v52_v33  ;;  %v13_v27 = vld [vmem:[%s2653_s0 + $0x10] sm:$0xff]  ;;  %v2412_v33 = vpack.c.bf16 %v16_v31, %v15_v30  ;;  %v873_v30 = vld [vmem:[%s2654_s1 + $0xd8] sm:$0xff] }
 0x13d   :  { %v2308_v35 = vadd.f32 %v1822_v29, %v59_v34  ;;  %v2402_v29 = vpack.c.bf16 %v14_v28, %v13_v27  ;;  %v1835_v34 = vld [vmem:[%s2654_s1 + $0x80] ss:$0 sm:$0xff]  ;;  %v872_v28 = vld [vmem:[%s2654_s1 + $0xd0] sm:$0xff] }
 0x13e   :  { %v2151_v31 = vpack.c.bf16 %v873_v30, %v872_v28 }
 0x13f   :  { %1967 = vmatmul.mubr.msk.f32.vlgmr.msra.gmra.mrb[0].mxu0 %vm25_vm0, %v2308_v35 }
 0x140   :  { %2126 = vmatpush3.bf16.msra.mxu0 %v2123_v9  ;;  %v2139_v9 = vpack.c.bf16 %v779_v8, %v778_v7 }
 0x141   :  { %2128 = vmatprep.subr.bf16.mxu0 %v2402_v29 }
 0x212   :  { %v1968_v46 = vpop.f32.mrb[0].mxu0 }
 0x213   :  { %v154_v49 = vadd.f32 %v1968_v46, %v1823_v45  ;;  %v148_v50 = vpop.f32.mrb[1].mxu0  ;;  %v2431_v46 = vld [vmem:[%s2653_s0 + $0x48] sm:$0xff] }
 0x214   :  { %v149_v51 = vadd.f32 %v1823_v45, %v148_v50  ;;  %v2426_v45 = vld [vmem:[%s2653_s0 + $0x50] sm:$0xff] }
 0x215   :  { %v189_v52 = vrot.slane %v154_v49, 7  ;;  %v367_v53 = vrot.slane %v154_v49, 6 }
 0x216   :  { %v188_v54 = vrot.slane %v149_v51, 7  ;;  %v366_v55 = vrot.slane %v149_v51, 6 }
 0x218   :  { %v192_v60 = vsel %vm190_vm1, %v189_v52, %v188_v54  ;;  %v191_v61 = vsel %vm190_vm1, %v188_v54, %v189_v52  ;;  %v370_v62 = vsel %vm368_vm2, %v367_v53, %v366_v55  ;;  %v369_v63 = vsel %vm368_vm2, %v366_v55, %v367_v53 }
 0x219   :  { %v197_v0 = vsel %vm2333_vm3, %v192_v60, 0.0  ;;  %v198_v1 = vsel %vm2337_vm4, %v191_v61, 0.0  ;;  %v375_v4 = vsel %vm2362_vm6, %v370_v62, 0.0  ;;  %v376_v6 = vsel %vm2370_vm7, %v369_v63, 0.0 }
 0x21a   :  { %1973 = vmatprep.mubr.msk.f32.mxu1 %vm201_vm5, %v197_v0 }
 0x21b   :  { %1974 = vmatmul.mubr.msk.f32.vlgmr.msra.gmra.mrb[0].mxu1 %vm201_vm5, %v198_v1  ;;  %v17_v1 = vld [vmem:[%s2653_s0 + $0x30] sm:$0xff] }
 0x21c   :  { %2118 = vmatpush3.bf16.msra.mxu1 %v2115_v41  ;;  %1980 = vmatprep.mubr.msk.f32.mxu1 %vm201_vm5, %v149_v51 }
 0x21d   :  { %2120 = vmatprep.subr.bf16.mxu1 %v2119_v2 }
 0x223   :  { %1981 = vmatmul.mubr.msk.f32.vlgmr.msra.gmra.mrb[0].mxu1 %vm201_vm5, %v154_v49 }
 0x224   :  { %2122 = vmatpush3.bf16.msra.mxu1 %v2119_v2  ;;  %1987 = vmatprep.mubr.msk.f32.mxu1 %vm201_vm5, %v375_v4  ;;  %v18_v2 = vld [vmem:[%s2653_s0 + $0x38] sm:$0xff] }
 0x225   :  { %v2445_v4 = vpack.c.bf16 %v18_v2, %v17_v1 }
 0x227   :  { %2136 = vmatprep.subr.bf16.mxu1 %v2445_v4 }
 0x22b   :  { %1988 = vmatmul.mubr.msk.f32.vlgmr.msra.gmra.mrb[0].mxu1 %vm201_vm5, %v376_v6  ;;  %v2452_v6 = vld [vmem:[%s2653_s0 + $0x40] sm:$0xf] }
 0x22c   :  { %2138 = vmatpush3.bf16.msra.mxu1 %v2445_v4 }
 0x22d   :  { %2012 = vmatprep.subr.msk.mxu1 %vm697_vm9, %v2452_v6 }
 0x230   :  { %2013 = vmatpush3.msk.msra.mxu1 %vm697_vm9, %v2452_v6 }
 0x231   :  { %2140 = vmatprep.subr.bf16.mxu1 %v2139_v9 }
 0x2fe   :  { %v1989_v11 = vpop.f32.mrb[0].mxu1 }
 0x2ff   :  { %v468_v12 = vadd.f32 %v1989_v11, %v1832_v10  ;;  %v451_v13 = vpop.f32.mrb[1].mxu1 }
 0x300   :  { %v467_v14 = vadd.f32 %v1832_v10, %v451_v13 }
 0x301   :  { %v1834_v15 = vmul.f32 -1.442695, %v468_v12 }
 0x302   :  { %v1833_v16 = vmul.f32 -1.442695, %v467_v14 }
 0x303   :  { %2207 = vpow2.f32 %v1834_v15 }
 0x304   :  { %2209 = vpow2.f32 %v1833_v16  ;;  %v780_v16 = vld [vmem:[%s2654_s1 + $0x98] sm:$0xff] }
 0x30d   :  { %v2208_v17 = vpop.eup %2207 }
 0x30e   :  { %v2210_v18 = vpop.eup %2209  ;;  %v476_v19 = vadd.f32 1.0, %v2208_v17  ;;  %v781_v17 = vld [vmem:[%s2654_s1 + $0xa0] sm:$0xff] }
 0x30f   :  { %v475_v20 = vadd.f32 1.0, %v2210_v18  ;;  %v2143_v18 = vpack.c.bf16 %v781_v17, %v780_v16  ;;  %v1855_v17 = vld [vmem:[%s2654_s1 + $0xf8] ss:$0 sm:$0xff] }
 0x310   :  { %2211 = vrcp.f32 %v476_v19 }
 0x311   :  { %2213 = vrcp.f32 %v475_v20 }
 0x31a   :  { %v2212_v21 = vpop.eup %2211 }
 0x31b   :  { %v2214_v22 = vpop.eup %2213  ;;  %485 = vrot.lane.b32.xlu1 %v2212_v21, %s2259_s17 }
 0x31c   :  { %483 = vrot.lane.b32.xlu0 %v2214_v22, %s2259_s17 }
 0x38d   :  { %v486_v23 = vpop.permute.xlu1 %485 }
 0x38e   :  { %v484_v24 = vpop.permute.xlu0 %483  ;;  %v2390_v26 = vmul.f32 %v486_v23, %v468_v12  ;;  %v880_v23 = vld [vmem:[%s2654_s1 + $0xc0] sm:$0xff] }
 0x38f   :  { %v2388_v25 = vmul.f32 %v484_v24, %v467_v14  ;;  %v881_v24 = vld [vmem:[%s2654_s1 + $0xc8] sm:$0xff] }
 0x390   :  { %v2147_v27 = vpack.c.bf16 %v881_v24, %v880_v23 }
 0x391   :  { %1994 = vmatprep.mubr.msk.f32.mxu0 %vm201_vm5, %v2388_v25 }
 0x392   :  { %1995 = vmatmul.mubr.msk.f32.vlgmr.msra.gmra.mrb[2].mxu0 %vm201_vm5, %v2390_v26 }
 0x393   :  { %2130 = vmatpush3.bf16.msra.mxu0 %v2402_v29 }
 0x394   :  { %2132 = vmatprep.subr.bf16.mxu0 %v2412_v33 }
 0x397   :  { %2134 = vmatpush3.bf16.msra.mxu0 %v2412_v33 }
 0x398   :  { %2148 = vmatprep.subr.bf16.mxu0 %v2147_v27 }
 0x465   :  { %v1996_v36 = vpop.f32.mrb[2].mxu0 }
 0x466   :  { %v576_v37 = vadd.f32 %v1996_v36, %v1835_v34  ;;  %v570_v38 = vpop.f32.mrb[3].mxu0 }
 0x467   :  { %v571_v39 = vadd.f32 %v1835_v34, %v570_v38  ;;  %v1843_v34 = vld [vmem:[%s2654_s1 + $0xa8] ss:$0 sm:$0xff] }
 0x468   :  { %v580_v40 = vadd.f32 %v576_v37, %v2308_v35 }
 0x469   :  { %v579_v41 = vadd.f32 %v571_v39, %v2304_v32 }
 0x46a   :  { %v582_v44 = vmul.f32 0.70710677, %v580_v40 }
 0x46b   :  { %v581_v42 = vmul.f32 0.70710677, %v579_v41 }
 0x46d   :  { %2005 = vmatprep.mubr.msk.f32.mxu0 %vm25_vm0, %v581_v42 }
 0x46e   :  { %2006 = vmatmul.mubr.msk.f32.vlgmr.msra.gmra.mrb[4].mxu0 %vm25_vm0, %v582_v44 }
 0x46f   :  { %2150 = vmatpush3.bf16.msra.mxu0 %v2147_v27 }
 0x470   :  { %2152 = vmatprep.subr.bf16.mxu0 %v2151_v31 }
 0x541   :  { %v2007_v47 = vpop.f32.mrb[4].mxu0 }
 0x542   :  { %v661_v48 = vadd.f32 %v2007_v47, %v2426_v45  ;;  %v655_v49 = vpop.f32.mrb[5].mxu0 }
 0x543   :  { %v656_v50 = vadd.f32 %v655_v49, %v2431_v46 }
 0x544   :  { %v668_v51 = vsel %vm664_vm8, %v661_v48, -inf }
 0x545   :  { %669 = vmax.xlane.f32.xlu0 %v668_v51  ;;  %v665_v52 = vsel %vm664_vm8, %v656_v50, -inf  ;;  %v1050_v51 = vld [vmem:[%s2654_s1 + $0xb0] sm:$0xff] }
 0x546   :  { %666 = vmax.xlane.f32.xlu1 %v665_v52  ;;  %v1051_v52 = vld [vmem:[%s2654_s1 + $0xb8] sm:$0xff] }
 0x5d2   :  { %v670_v53 = vpop.xlane.xlu0 %669 }
 0x5d3   :  { %v672_v54 = vsub.f32 %v661_v48, %v670_v53  ;;  %v667_v55 = vpop.xlane.xlu1 %666 }
 0x5d4   :  { %v671_v58 = vsub.f32 %v656_v50, %v667_v55 }
 0x5d5   :  { %v675_v59 = vmul.f32 1.442695, %v672_v54 }
 0x5d6   :  { %v673_v60 = vmul.f32 1.442695, %v671_v58 }
 0x5d7   :  { %2215 = vpow2.f32 %v675_v59  ;;  %v2155_v59 = vpack.c.bf16 %v1051_v52, %v1050_v51  ;;  %v1446_v52 = vld [vmem:[%s2654_s1 + $0x100] sm:$0xff] }
 0x5d8   :  { %2217 = vpow2.f32 %v673_v60  ;;  %v1852_v60 = vld [vmem:[%s2654_s1 + $0xe0] ss:$0 sm:$0xff] }
 0x5e1   :  { %v2216_v61 = vpop.eup %2215 }
 0x5e2   :  { %v2218_v62 = vpop.eup %2217  ;;  %v680_v63 = vsel %vm664_vm8, %v2216_v61, 0.0 }
 0x5e3   :  { %681 = vadd.xlane.f32.xlu1 %v680_v63  ;;  %v677_v0 = vsel %vm664_vm8, %v2218_v62, 0.0 }
 0x5e4   :  { %678 = vadd.xlane.f32.xlu0 %v677_v0 }
 0x670   :  { %v682_v10 = vpop.xlane.xlu1 %681 }
 0x671   :  { %2219 = vrcp.f32 %v682_v10  ;;  %v679_v11 = vpop.xlane.xlu0 %678 }
 0x672   :  { %2221 = vrcp.f32 %v679_v11 }
 0x67b   :  { %v2220_v12 = vpop.eup %2219 }
 0x67c   :  { %v2222_v13 = vpop.eup %2221  ;;  %v2466_v15 = vmul.f32 %v2220_v12, %v2216_v61 }
 0x67d   :  { %v2464_v14 = vmul.f32 %v2222_v13, %v2218_v62 }
 0x67f   :  { %2014 = vmatprep.mubr.msk.f32.mxu1 %vm664_vm8, %v2464_v14 }
 0x680   :  { %2015 = vmatmul.mubr.msk.f32.vlgmr.msra.gmra.mrb[2].mxu1 %vm664_vm8, %v2466_v15 }
 0x681   :  { %2142 = vmatpush3.bf16.msra.mxu1 %v2139_v9 }
 0x682   :  { %2144 = vmatprep.subr.bf16.mxu1 %v2143_v18 }
 0x685   :  { %2146 = vmatpush3.bf16.msra.mxu1 %v2143_v18 }
 0x686   :  { %2160 = vmatprep.subr.bf16.mxu1 %v2159_v5 }
 0x753   :  { %v2016_v19 = vpop.f32.mrb[2].mxu1 }
 0x754   :  { %v767_v20 = vpop.f32.mrb[3].mxu1  ;;  %v777_v22 = vmul.f32 3.1622777, %v2016_v19 }
 0x755   :  { %v776_v21 = vmul.f32 3.1622777, %v767_v20 }
 0x757   :  { %2025 = vmatprep.mubr.msk.f32.mxu1 %vm25_vm0, %v776_v21 }
 0x758   :  { %2026 = vmatmul.mubr.msk.f32.vlgmr.msra.gmra.mrb[4].mxu1 %vm25_vm0, %v777_v22 }
 0x759   :  { %2162 = vmatpush3.bf16.msra.mxu1 %v2159_v5 }
 0x75a   :  { %2164 = vmatprep.subr.bf16.mxu1 %v2402_v29 }
 0x82b   :  { %v2027_v36 = vpop.f32.mrb[4].mxu1 }
 0x82c   :  { %v865_v37 = vadd.f32 %v2027_v36, %v1843_v34  ;;  %v859_v38 = vpop.f32.mrb[5].mxu1 }
 0x82d   :  { %v860_v39 = vadd.f32 %v1843_v34, %v859_v38 }
 0x82e   :  { %v869_v40 = vadd.f32 %v865_v37, %v2390_v26 }
 0x82f   :  { %v868_v41 = vadd.f32 %v860_v39, %v2388_v25 }
 0x830   :  { %v871_v42 = vmul.f32 0.70710677, %v869_v40 }
 0x831   :  { %v870_v44 = vmul.f32 0.70710677, %v868_v41 }
 0x832   :  { %v875_v47 = vrot.slane %v871_v42, 7  ;;  %v1045_v48 = vrot.slane %v871_v42, 6 }
 0x833   :  { %v874_v49 = vrot.slane %v870_v44, 7  ;;  %v1044_v50 = vrot.slane %v870_v44, 6 }
 0x835   :  { %v877_v53 = vsel %vm190_vm1, %v875_v47, %v874_v49  ;;  %v876_v25 = vsel %vm190_vm1, %v874_v49, %v875_v47  ;;  %v1047_v26 = vsel %vm368_vm2, %v1045_v48, %v1044_v50  ;;  %v1046_v54 = vsel %vm368_vm2, %v1044_v50, %v1045_v48 }
 0x836   :  { %v878_v55 = vsel %vm2333_vm3, %v877_v53, 0.0  ;;  %v879_v58 = vsel %vm2337_vm4, %v876_v25, 0.0  ;;  %v1048_v43 = vsel %vm2362_vm6, %v1047_v26, 0.0  ;;  %v1049_v56 = vsel %vm2370_vm7, %v1046_v54, 0.0 }
 0x837   :  { %2032 = vmatprep.mubr.msk.f32.mxu0 %vm201_vm5, %v878_v55 }
 0x838   :  { %2033 = vmatmul.mubr.msk.f32.vlgmr.msra.gmra.mrb[6].mxu0 %vm201_vm5, %v879_v58 }
 0x839   :  { %2154 = vmatpush3.bf16.msra.mxu0 %v2151_v31  ;;  %2039 = vmatprep.mubr.msk.f32.mxu0 %vm201_vm5, %v870_v44 }
 0x83a   :  { %2156 = vmatprep.subr.bf16.mxu0 %v2155_v59 }
 0x840   :  { %2040 = vmatmul.mubr.msk.f32.vlgmr.msra.gmra.mrb[6].mxu0 %vm201_vm5, %v871_v42 }
 0x841   :  { %2158 = vmatpush3.bf16.msra.mxu0 %v2155_v59  ;;  %2046 = vmatprep.mubr.msk.f32.mxu0 %vm201_vm5, %v1048_v43  ;;  %v688_v59 = vmul.f32 0.5, %v2466_v15  ;;  %v1449_v15 = vld [vmem:[%s2654_s1 + $0x118] sm:$0xff] }
 0x842   :  { %2172 = vmatprep.subr.bf16.mxu0 %v2445_v4 }
 0x848   :  { %2047 = vmatmul.mubr.msk.f32.vlgmr.msra.gmra.mrb[6].mxu0 %vm201_vm5, %v1049_v56  ;;  %v687_v56 = vmul.f32 0.5, %v2464_v14  ;;  %v1448_v14 = vld [vmem:[%s2654_s1 + $0x110] sm:$0xff] }
 0x849   :  { %2174 = vmatpush3.bf16.msra.mxu0 %v2445_v4 }
 0x84a   :  { %2071 = vmatprep.subr.msk.mxu0 %vm697_vm9, %v2452_v6 }
 0x84d   :  { %2072 = vmatpush3.msk.msra.mxu0 %vm697_vm9, %v2452_v6 }
 0x91b   :  { %v2048_v61 = vpop.f32.mrb[6].mxu0 }
 0x91c   :  { %v1141_v62 = vadd.f32 %v2048_v61, %v1852_v60  ;;  %v1124_v63 = vpop.f32.mrb[7].mxu0 }
 0x91d   :  { %v1140_v0 = vadd.f32 %v1852_v60, %v1124_v63 }
 0x91e   :  { %v1854_v1 = vmul.f32 -1.442695, %v1141_v62 }
 0x91f   :  { %v1853_v2 = vmul.f32 -1.442695, %v1140_v0 }
 0x920   :  { %2223 = vpow2.f32 %v1854_v1 }
 0x921   :  { %2225 = vpow2.f32 %v1853_v2 }
 0x92a   :  { %v2224_v4 = vpop.eup %2223 }
 0x92b   :  { %v2226_v6 = vpop.eup %2225  ;;  %v1149_v7 = vadd.f32 1.0, %v2224_v4  ;;  %v1587_v4 = vld [vmem:[%s2654_s1 + $0x140] sm:$0xff] }
 0x92c   :  { %v1148_v8 = vadd.f32 1.0, %v2226_v6  ;;  %v1588_v6 = vld [vmem:[%s2654_s1 + $0x148] sm:$0xff] }
 0x92d   :  { %2227 = vrcp.f32 %v1149_v7  ;;  %v2183_v7 = vpack.c.bf16 %v1588_v6, %v1587_v4 }
 0x92e   :  { %2229 = vrcp.f32 %v1148_v8  ;;  %v1863_v8 = vld [vmem:[%s2654_s1 + $0x120] ss:$0 sm:$0xff] }
 0x937   :  { %v2228_v9 = vpop.eup %2227 }
 0x938   :  { %v2230_v10 = vpop.eup %2229  ;;  %1158 = vrot.lane.b32.xlu1 %v2228_v9, %s2259_s17 }
 0x939   :  { %1156 = vrot.lane.b32.xlu0 %v2230_v10, %s2259_s17 }
 0x9aa   :  { %v1159_v11 = vpop.permute.xlu1 %1158 }
 0x9ab   :  { %v1157_v12 = vpop.permute.xlu0 %1156  ;;  %v2545_v16 = vmul.f32 %v1159_v11, %v1141_v62  ;;  %v2179_v62 = vpack.c.bf16 %v1449_v15, %v1448_v14 }
 0x9ac   :  { %v2543_v13 = vmul.f32 %v1157_v12, %v1140_v0 }
 0x9ae   :  { %2053 = vmatprep.mubr.msk.f32.mxu1 %vm201_vm5, %v2543_v13 }
 0x9af   :  { %2054 = vmatmul.mubr.msk.f32.vlgmr.msra.gmra.mrb[6].mxu1 %vm201_vm5, %v2545_v16 }
 0x9b0   :  { %2166 = vmatpush3.bf16.msra.mxu1 %v2402_v29 }
 0x9b1   :  { %2168 = vmatprep.subr.bf16.mxu1 %v2412_v33 }
 0x9b4   :  { %2170 = vmatpush3.bf16.msra.mxu1 %v2412_v33 }
 0x9b5   :  { %2184 = vmatprep.subr.bf16.mxu1 %v2183_v7 }
 0xa82   :  { %v2055_v18 = vpop.f32.mrb[6].mxu1 }
 0xa83   :  { %v1249_v19 = vadd.f32 %v2055_v18, %v1855_v17  ;;  %v1243_v20 = vpop.f32.mrb[7].mxu1 }
 0xa84   :  { %v1244_v21 = vadd.f32 %v1855_v17, %v1243_v20 }
 0xa85   :  { %v1253_v22 = vadd.f32 %v1249_v19, %v2308_v35  ;;  %v1866_v19 = vld [vmem:[%s2654_s1 + $0x128] ss:$0 sm:$0xff] }
 0xa86   :  { %v1252_v23 = vadd.f32 %v1244_v21, %v2304_v32 }
 0xa87   :  { %v1255_v27 = vmul.f32 0.70710677, %v1253_v22 }
 0xa88   :  { %v1254_v24 = vmul.f32 0.70710677, %v1252_v23 }
 0xa8a   :  { %2064 = vmatprep.mubr.msk.f32.mxu1 %vm25_vm0, %v1254_v24 }
 0xa8b   :  { %2065 = vmatmul.mubr.msk.f32.vlgmr.msra.gmra.mrb[8].mxu1 %vm25_vm0, %v1255_v27 }
 0xa8c   :  { %2186 = vmatpush3.bf16.msra.mxu1 %v2183_v7 }
 0xb5e   :  { %v2066_v29 = vpop.f32.mrb[8].mxu1 }
 0xb5f   :  { %v1334_v33 = vadd.f32 %v2066_v29, %v2426_v45  ;;  %v1328_v28 = vpop.f32.mrb[9].mxu1  ;;  %v1867_v45 = vld [vmem:[%s2654_s1 + $0x130] ss:$0 sm:$0xff]  ;;  %v1868_v29 = vld [vmem:[%s2654_s1 + $0x138] ss:$0 sm:$0xff] }
 0xb60   :  { %v1329_v30 = vadd.f32 %v1328_v28, %v2431_v46  ;;  %v1558_v47 = vmul.f32 %v1867_v45, %v2304_v32  ;;  %v1559_v50 = vmul.f32 %v1867_v45, %v2308_v35  ;;  %v1447_v32 = vld [vmem:[%s2654_s1 + $0x108] sm:$0xff] }
 0xb61   :  { %v1340_v31 = vsel %vm664_vm8, %v1334_v33, -inf  ;;  %v2175_v53 = vpack.c.bf16 %v1447_v32, %v1446_v52  ;;  %v24_v52 = vld [vmem:[%s2653_s0 + $0x68] sm:$0xf]  ;;  %v1871_v32 = vld [vmem:[%s2654_s1 + $0x150] ss:$0 sm:$0xff] }
 0xb62   :  { %1341 = vmax.xlane.f32.xlu0 %v1340_v31  ;;  %v1337_v34 = vsel %vm664_vm8, %v1329_v30, -inf  ;;  %v1560_v49 = vsel %vm25_vm0, %v1558_v47, 0.0  ;;  %v1563_v51 = vsel %vm25_vm0, %v1559_v50, 0.0  ;;  %v23_v47 = vld [vmem:[%s2653_s0 + $0x60] sm:$0xff] }
 0xb63   :  { %1338 = vmax.xlane.f32.xlu1 %v1337_v34  ;;  %2176 = vmatprep.subr.bf16.mxu0 %v2175_v53 }
 0xbef   :  { %v1342_v36 = vpop.xlane.xlu0 %1341 }
 0xbf0   :  { %v1344_v37 = vsub.f32 %v1334_v33, %v1342_v36  ;;  %v1339_v38 = vpop.xlane.xlu1 %1338 }
 0xbf1   :  { %v1343_v39 = vsub.f32 %v1329_v30, %v1339_v38 }
 0xbf2   :  { %v1347_v40 = vmul.f32 1.442695, %v1344_v37 }
 0xbf3   :  { %v1345_v41 = vmul.f32 1.442695, %v1343_v39 }
 0xbf4   :  { %2231 = vpow2.f32 %v1347_v40 }
 0xbf5   :  { %2233 = vpow2.f32 %v1345_v41 }
 0xbfe   :  { %v2232_v42 = vpop.eup %2231 }
 0xbff   :  { %v2234_v46 = vpop.eup %2233  ;;  %v1352_v44 = vsel %vm664_vm8, %v2232_v42, 0.0 }
 0xc00   :  { %1353 = vadd.xlane.f32.xlu1 %v1352_v44  ;;  %v1349_v48 = vsel %vm664_vm8, %v2234_v46, 0.0  ;;  %v22_v44 = vld [vmem:[%s2653_s0 + $0x58] sm:$0xff] }
 0xc01   :  { %1350 = vadd.xlane.f32.xlu0 %v1349_v48 }
 0xc04   :  { %1561 = vadd.xlane.f32.xlu1 %v1560_v49  ;;  %v2187_v49 = vpack.c.bf16 %v23_v47, %v22_v44 }
 0xc06   :  { %2188 = vmatprep.subr.bf16.mxu1 %v2187_v49 }
 0xc08   :  { %1564 = vadd.xlane.f32.xlu1 %v1563_v51 }
 0xc8d   :  { %v1354_v25 = vpop.xlane.xlu1 %1353 }
 0xc8e   :  { %2235 = vrcp.f32 %v1354_v25  ;;  %v1351_v26 = vpop.xlane.xlu0 %1350 }
 0xc8f   :  { %2237 = vrcp.f32 %v1351_v26 }
 0xc98   :  { %v2236_v54 = vpop.eup %2235 }
 0xc99   :  { %v2238_v35 = vpop.eup %2237  ;;  %v2580_v55 = vmul.f32 %v2236_v54, %v2232_v42 }
 0xc9a   :  { %v2582_v58 = vmul.f32 %v2238_v35, %v2234_v46 }
 0xc9b   :  { %v1360_v43 = vmul.f32 0.5, %v2580_v55 }
 0xc9c   :  { %v1359_v57 = vmul.f32 0.5, %v2582_v58  ;;  %2073 = vmatprep.mubr.msk.f32.mxu0 %vm664_vm8, %v2582_v58 }
 0xc9d   :  { %2074 = vmatmul.mubr.msk.f32.vlgmr.msra.gmra.mrb[8].mxu0 %vm664_vm8, %v2580_v55  ;;  %v1362_v3 = vadd.f32 %v1360_v43, %v688_v59 }
 0xc9e   :  { %v1361_v5 = vadd.f32 %v1359_v57, %v687_v56  ;;  %2178 = vmatpush3.bf16.msra.mxu0 %v2175_v53 }
 0xc9f   :  { %v1812_v60 = vsel %vm664_vm8, %v1362_v3, 0.0  ;;  %2180 = vmatprep.subr.bf16.mxu0 %v2179_v62 }
 0xca0   :  { %v1811_v61 = vsel %vm664_vm8, %v1361_v5, 0.0  ;;  %1816 = vst [vmem:[%s2655_s2 + $0x18] sm:$0xff] %v1812_v60 }
 0xca1   :  { %1814 = vst [vmem:[%s2655_s2 + $0x8] sm:$0xff] %v1811_v61 }
 0xca2   :  { %2182 = vmatpush3.bf16.msra.mxu0 %v2179_v62 }
 0xd70   :  { %v2075_v63 = vpop.f32.mrb[8].mxu0 }
 0xd71   :  { %v1435_v0 = vpop.f32.mrb[9].mxu0  ;;  %v1445_v2 = vmul.f32 3.1622777, %v2075_v63 }
 0xd72   :  { %v1444_v1 = vmul.f32 3.1622777, %v1435_v0 }
 0xd74   :  { %2084 = vmatprep.mubr.msk.f32.mxu0 %vm25_vm0, %v1444_v1 }
 0xd75   :  { %2085 = vmatmul.mubr.msk.f32.vlgmr.msra.gmra.mrb[10].mxu0 %vm25_vm0, %v1445_v2 }
 0xe48   :  { %v2086_v9 = vpop.f32.mrb[10].mxu0 }
 0xe49   :  { %v1533_v10 = vadd.f32 %v2086_v9, %v1863_v8  ;;  %v1527_v11 = vpop.f32.mrb[11].mxu0 }
 0xe4a   :  { %v1528_v12 = vadd.f32 %v1863_v8, %v1527_v11 }
 0xe4b   :  { %v1537_v17 = vadd.f32 %v1533_v10, %v2545_v16  ;;  %v2260_v16 = vmov 0  }
 0xe4c   :  { %v1536_v18 = vadd.f32 %v1528_v12, %v2543_v13  ;;  %2201 = vset.pattern.permute.xlu0 %v2260_v16  ;;  %2202 = vset.pattern.permute.xlu1 %v2260_v16  ;;  %v1562_v13 = vpop.xlane.xlu1 %1561 }
 0xe4d   :  { %v1539_v20 = vmul.f32 0.70710677, %v1537_v17 }
 0xe4e   :  { %v1538_v21 = vmul.f32 0.70710677, %v1536_v18 }
 0xe4f   :  { %v1546_v24 = vmul.f32 %v1866_v19, %v1539_v20 }
 0xe50   :  { %2091 = vmatprep.mubr.msk.f32.mxu1 %vm201_vm5, %v1538_v21  ;;  %v1545_v22 = vmul.f32 %v1866_v19, %v1538_v21  ;;  %v1565_v31 = vpop.xlane.xlu1 %1564 }
 0xe51   :  { %2092 = vmatmul.mubr.msk.f32.vlgmr.msra.gmra.mrb[10].mxu1 %vm201_vm5, %v1539_v20  ;;  %v1550_v27 = vsel %vm201_vm5, %v1546_v24, 0.0 }
 0xe52   :  { %v1547_v23 = vsel %vm201_vm5, %v1545_v22, 0.0  ;;  %2190 = vmatpush3.bf16.msra.mxu1 %v2187_v49 }
 0xe53   :  { %1548 = vadd.xlane.f32.xlu0 %v1547_v23  ;;  %2098 = vmatprep.subr.msk.mxu1 %vm697_vm9, %v24_v52 }
 0xe56   :  { %2099 = vmatpush3.msk.msra.mxu1 %vm697_vm9, %v24_v52 }
 0xe57   :  { %1551 = vadd.xlane.f32.xlu0 %v1550_v27 }
 0xee0   :  { %v1549_v33 = vpop.xlane.xlu0 %1548 }
 0xee1   :  { %v1566_v28 = vadd.f32 %v1562_v13, %v1549_v33 }
 0xee3   :  { %v1573_v30 = vadd.f32 %v1868_v29, %v1566_v28 }
 0xee4   :  { %v1552_v34 = vpop.xlane.xlu0 %1551 }
 0xee5   :  { %v1869_v36 = vmul.f32 -1.442695, %v1573_v30  ;;  %v1567_v37 = vadd.f32 %v1565_v31, %v1552_v34 }
 0xee7   :  { %2239 = vpow2.f32 %v1869_v36  ;;  %v1574_v38 = vadd.f32 %v1868_v29, %v1567_v37 }
 0xee9   :  { %v1870_v39 = vmul.f32 -1.442695, %v1574_v38 }
 0xeeb   :  { %2241 = vpow2.f32 %v1870_v39 }
 0xef1   :  { %v2240_v40 = vpop.eup %2239 }
 0xef2   :  { %v1581_v41 = vadd.f32 1.0, %v2240_v40 }
 0xef4   :  { %2243 = vrcp.f32 %v1581_v41 }
 0xef5   :  { %v2242_v45 = vpop.eup %2241 }
 0xef6   :  { %v1582_v42 = vadd.f32 1.0, %v2242_v45 }
 0xef8   :  { %2245 = vrcp.f32 %v1582_v42 }
 0xefe   :  { %v2244_v46 = vpop.eup %2243 }
 0xeff   :  { %v1705_v48 = vsub.f32 1.0, %v2244_v46 }
 0xf01   :  { %1709 = vperm.xlu0 %2201, %v1705_v48  }
 0xf02   :  { %v2246_v50 = vpop.eup %2245 }
 0xf03   :  { %v1706_v51 = vsub.f32 1.0, %v2246_v50 }
 0xf05   :  { %1714 = vperm.xlu1 %2202, %v1706_v51  }
 0xf24   :  { %v2093_v53 = vpop.f32.mrb[10].mxu1 }
 0xf25   :  { %v1672_v25 = vadd.f32 %v2093_v53, %v1871_v32  ;;  %v1666_v26 = vpop.f32.mrb[11].mxu1 }
 0xf26   :  { %v1667_v54 = vadd.f32 %v1871_v32, %v1666_v26 }
 0xf27   :  { %1677 = vmax.xlane.f32.xlu0 %v1672_v25 }
 0xf29   :  { %1675 = vmax.xlane.f32.xlu1 %v1667_v54 }
 0xf3d   :  { %1700 = vperm.xlu0 %2201, %v2246_v50  }
 0xf80   :  { %v1710_v35 = vpop.permute.xlu0 %1709 }
 0xf81   :  { %v1717_v59 = vmul.f32 %v1710_v35, %v2582_v58 }
 0xf83   :  { %2100 = vmatprep.mubr.msk.f32.mxu1 %vm664_vm8, %v1717_v59 }
 0xf84   :  { %v1715_v43 = vpop.permute.xlu1 %1714 }
 0xf85   :  { %v1718_v56 = vmul.f32 %v1715_v43, %v2580_v55 }
 0xf87   :  { %2101 = vmatmul.mubr.msk.f32.vlgmr.msra.gmra.mrb[12].mxu1 %vm664_vm8, %v1718_v56 }
 0xfb4   :  { %v1678_v57 = vpop.xlane.xlu0 %1677 }
 0xfb5   :  { %v1680_v3 = vsub.f32 %v1672_v25, %v1678_v57 }
 0xfb6   :  { %v1676_v5 = vpop.xlane.xlu1 %1675 }
 0xfb7   :  { %v1683_v60 = vmul.f32 1.442695, %v1680_v3  ;;  %v1679_v61 = vsub.f32 %v1667_v54, %v1676_v5 }
 0xfb9   :  { %2247 = vpow2.f32 %v1683_v60  ;;  %v1681_v14 = vmul.f32 1.442695, %v1679_v61 }
 0xfbb   :  { %2249 = vpow2.f32 %v1681_v14 }
 0xfbc   :  { %v1701_v4 = vpop.permute.xlu0 %1700 }
 0xfc3   :  { %v2248_v15 = vpop.eup %2247 }
 0xfc4   :  { %1687 = vadd.xlane.f32.xlu1 %v2248_v15 }
 0xfc5   :  { %v2250_v62 = vpop.eup %2249 }
 0xfc8   :  { %1685 = vadd.xlane.f32.xlu1 %v2250_v62 }
 0xfd9   :  { %1695 = vperm.xlu1 %2202, %v2244_v46  }
0x1051   :  { %v1688_v58 = vpop.xlane.xlu1 %1687 }
0x1052   :  { %2251 = vrcp.f32 %v1688_v58 }
0x1055   :  { %v1686_v63 = vpop.xlane.xlu1 %1685 }
0x1056   :  { %2253 = vrcp.f32 %v1686_v63 }
0x1059   :  { %v1696_v10 = vpop.permute.xlu1 %1695 }
0x105a   :  { %v2102_v55 = vpop.f32.mrb[12].mxu1 }
0x105b   :  { %v1794_v0 = vpop.f32.mrb[13].mxu1 }
0x105c   :  { %v2252_v1 = vpop.eup %2251 }
0x105d   :  { %v1692_v2 = vmul.f32 %v2252_v1, %v2248_v15 }
0x105f   :  { %v1704_v6 = vmul.f32 %v1701_v4, %v1692_v2 }
0x1060   :  { %v2254_v7 = vpop.eup %2253 }
0x1061   :  { %v1690_v8 = vmul.f32 %v2254_v7, %v2250_v62  ;;  %v1804_v9 = vadd.f32 %v2102_v55, %v1704_v6 }
0x1063   :  { %v1703_v11 = vmul.f32 %v1696_v10, %v1690_v8  ;;  %v1806_v12 = vadd.f32 1e-32, %v1804_v9 }
0x1065   :  { %2255 = vlog2.f32 %v1806_v12  ;;  %v1803_v17 = vadd.f32 %v1794_v0, %v1703_v11 }
0x1067   :  { %v1805_v18 = vadd.f32 1e-32, %v1803_v17 }
0x1069   :  { %2257 = vlog2.f32 %v1805_v18 }
0x106f   :  { %v2256_v19 = vpop.eup %2255 }
0x1070   :  { %v1810_v20 = vmul.f32 0.6931472, %v2256_v19 }
0x1072   :  { %1815 = vst [vmem:[%s2655_s2 + $0x10] sm:$0xff] %v1810_v20 }
0x1073   :  { %v2258_v21 = vpop.eup %2257 }
0x1074   :  { %v1808_v22 = vmul.f32 0.6931472, %v2258_v21 }
0x1076   :  { %1813 = vst [vmem:[%s2655_s2] sm:$0xff] %v1808_v22 }

</bundles_post_ra>
